<compile_context>
chip_gen: v6e
topology: v6e:2x2x1
jax: 0.10.0
libtpu: 0.0.40
codegen_flags: <defaults>
</compile_context>

<pallas_src>
import functools

import jax
import jax.numpy as jnp
import numpy as np
from jax.experimental import pallas as pl
from jax.experimental.pallas import tpu as pltpu

_VMEM_LIMIT_BYTES = 64 * 1024 * 1024   # explicit scoped-VMEM budget (fits v7x)
_LANE = 128

# TODO(synk): add a K grid axis + VMEM accumulator for very large K (>2048
#             channels) so weight blocks stay inside a 64 MiB VMEM budget with
#             double buffering.


def _round_up(x, m):
    return (x + m - 1) // m * m


def _pick_tile_n(n, tn):
    """Largest of (tn, 512, 256, 128) that divides n (n is a 128-multiple here)."""
    for c in (tn, 512, 256, 128):
        if c <= n and n % c == 0:
            return c
    return n


# ----------------------------- Pallas kernels ------------------------------ #
# bf16 operands on the MXU, f32 accumulation, f32 per-channel bias (BN scale
# pre-folded into the weights), optional ReLU, lane-dense outputs.

def _mm_bias_act_kernel(a_ref, wa_ref, bias_ref, o_ref, *, apply_relu):
    y = jnp.dot(a_ref[...], wa_ref[...], preferred_element_type=jnp.float32)
    y = y + bias_ref[...]
    if apply_relu:
        y = jnp.maximum(y, 0.0)
    o_ref[...] = y.astype(o_ref.dtype)


def _mm_bias_res_act_kernel(a_ref, wa_ref, r_ref, bias_ref, o_ref, *, apply_relu):
    y = jnp.dot(a_ref[...], wa_ref[...], preferred_element_type=jnp.float32)
    y = y + r_ref[...].astype(jnp.float32) + bias_ref[...]
    if apply_relu:
        y = jnp.maximum(y, 0.0)
    o_ref[...] = y.astype(o_ref.dtype)


def _dual_mm_bias_act_kernel(a_ref, wa_ref, b_ref, wb_ref, bias_ref, o_ref, *,
                             apply_relu):
    # conv3 and the projection shortcut fused: y = a@wa + b@wb + bias
    y = jnp.dot(a_ref[...], wa_ref[...], preferred_element_type=jnp.float32)
    y = y + jnp.dot(b_ref[...], wb_ref[...], preferred_element_type=jnp.float32)
    y = y + bias_ref[...]
    if apply_relu:
        y = jnp.maximum(y, 0.0)
    o_ref[...] = y.astype(o_ref.dtype)


def _conv3x3_taps_kernel(xph_ref, w_ref, bias_ref, o_ref, *, stride, Wh, Lo):
    """3x3 conv + BN bias + ReLU as 9 accumulated MXU dots (no HBM im2col).

    xph_ref block: (1, s, s, Hh*Wh, Cin) phase-split padded activation with
        xph[0, ph, pw, i*Wh + j, :] == padded_input[s*i + ph, s*j + pw, :]
    so tap (kh, kw) is the contiguous slice starting at (kh//s)*Wh + (kw//s)
    in phase (kh % s, kw % s).  All slices are static & contiguous.
    """
    s = stride
    acc = None
    for kh in range(3):
        for kw in range(3):
            base = (kh // s) * Wh + (kw // s)
            x2d = xph_ref[0, kh % s, kw % s, pl.ds(base, Lo), :]
            d = jnp.dot(x2d, w_ref[kh * 3 + kw],
                        preferred_element_type=jnp.float32)
            acc = d if acc is None else acc + d
    y = acc + bias_ref[...]
    o_ref[0] = jnp.maximum(y, 0.0).astype(o_ref.dtype)


# ----------------------------- pallas_call wrappers ------------------------- #

def _fused_matmul(a, wa, bias, b=None, wb=None, residual=None, *,
                  apply_relu=True, out_dtype=jnp.bfloat16, tm=512, tn=512):
    """o = act(a @ wa [+ b @ wb | + residual] + bias), (tm, tn)-tiled on the MXU."""
    M, Ka = a.shape
    Nn = wa.shape[1]
    tm_eff = min(tm, _round_up(M, 8))
    tn_eff = _pick_tile_n(Nn, tn)
    grid = (pl.cdiv(M, tm_eff), pl.cdiv(Nn, tn_eff))

    in_specs = [pl.BlockSpec((tm_eff, Ka), lambda i, j: (i, 0)),
                pl.BlockSpec((Ka, tn_eff), lambda i, j: (0, j))]
    args = [a, wa]
    flops = 2 * M * Ka * Nn
    if b is not None:
        Kb = b.shape[1]
        in_specs += [pl.BlockSpec((tm_eff, Kb), lambda i, j: (i, 0)),
                     pl.BlockSpec((Kb, tn_eff), lambda i, j: (0, j))]
        args += [b, wb]
        flops += 2 * M * Kb * Nn
        kernel = functools.partial(_dual_mm_bias_act_kernel, apply_relu=apply_relu)
    elif residual is not None:
        in_specs += [pl.BlockSpec((tm_eff, tn_eff), lambda i, j: (i, j))]
        args += [residual]
        kernel = functools.partial(_mm_bias_res_act_kernel, apply_relu=apply_relu)
    else:
        kernel = functools.partial(_mm_bias_act_kernel, apply_relu=apply_relu)
    in_specs.append(pl.BlockSpec((1, tn_eff), lambda i, j: (0, j)))
    args.append(bias)

    bytes_accessed = sum(int(np.prod(v.shape)) * np.dtype(v.dtype).itemsize
                         for v in args)
    bytes_accessed += M * Nn * np.dtype(out_dtype).itemsize

    return pl.pallas_call(
        kernel,
        out_shape=jax.ShapeDtypeStruct((M, Nn), out_dtype),
        grid=grid,
        in_specs=in_specs,
        out_specs=pl.BlockSpec((tm_eff, tn_eff), lambda i, j: (i, j)),
        compiler_params=pltpu.CompilerParams(
            dimension_semantics=("parallel", "parallel"),
            vmem_limit_bytes=_VMEM_LIMIT_BYTES),
        cost_estimate=pl.CostEstimate(flops=int(flops), transcendentals=0,
                                      bytes_accessed=int(bytes_accessed)),
    )(*args)


def _conv3x3_bn_relu(xph, w_taps, bias, *, stride, Wh, Lo,
                     out_dtype=jnp.bfloat16, tco=256):
    """Grid over (image, Cout-tile); each step accumulates the 9 conv taps."""
    N = xph.shape[0]
    s = stride
    Lh = xph.shape[3]
    Cin = xph.shape[4]
    Cout = w_taps.shape[2]
    tco_eff = _pick_tile_n(Cout, tco)
    grid = (N, Cout // tco_eff)
    kernel = functools.partial(_conv3x3_taps_kernel, stride=s, Wh=Wh, Lo=Lo)
    flops = 2 * N * 9 * Lo * Cin * Cout
    bytes_accessed = (int(np.prod(xph.shape)) * 2 + int(np.prod(w_taps.shape)) * 2
                      + int(np.prod(bias.shape)) * 4 + N * Lo * Cout * 2)
    return pl.pallas_call(
        kernel,
        out_shape=jax.ShapeDtypeStruct((N, Lo, Cout), out_dtype),
        grid=grid,
        in_specs=[
            pl.BlockSpec((1, s, s, Lh, Cin), lambda n, c: (n, 0, 0, 0, 0)),
            pl.BlockSpec((9, Cin, tco_eff), lambda n, c: (0, 0, c)),
            pl.BlockSpec((1, tco_eff), lambda n, c: (0, c)),
        ],
        out_specs=pl.BlockSpec((1, Lo, tco_eff), lambda n, c: (n, 0, c)),
        compiler_params=pltpu.CompilerParams(
            dimension_semantics=("parallel", "parallel"),
            vmem_limit_bytes=_VMEM_LIMIT_BYTES),
        cost_estimate=pl.CostEstimate(flops=int(flops), transcendentals=0,
                                      bytes_accessed=int(bytes_accessed)),
    )(xph, w_taps, bias)


# ----------------------------- glue (plain JAX) ----------------------------- #

def _phase_split_pad(x_nhwc, stride, Ho, Wo):
    """Zero-pad (for the 3x3/pad=1 conv) and split H/W into `stride` phases,
    flattening (row, col) -> row*Wh + col, so each conv tap becomes one
    contiguous 2-D slice inside the kernel.  One ~1x HBM copy, vs 9x im2col.

    Returns xph of shape (N, s, s, Hh*Wh, C) with
        xph[n, ph, pw, i*Wh + j, c] == pad(x)[n, s*i + ph, s*j + pw, c]
    """
    N, H, W, C = x_nhwc.shape
    s = stride
    Wh = Wo + 2 // s           # enough columns for the right-most tap
    Hh = Ho + 2 // s + 1       # +1 row of slack so flattened slices never overrun
    Hpad, Wpad = s * Hh, s * Wh
    xp = jnp.pad(x_nhwc, ((0, 0), (1, Hpad - H - 1), (1, Wpad - W - 1), (0, 0)))
    xp = xp.reshape(N, Hh, s, Wh, s, C).transpose(0, 2, 4, 1, 3, 5)
    return xp.reshape(N, s, s, Hh * Wh, C), Wh


def _prepare_params(params, Cin, P, EP, eps=1e-5):
    """Fold eval-mode BN into per-layer (bf16 weight, f32 bias); pad channels to 128."""
    Cp, Pp, EPp = (_round_up(c, _LANE) for c in (Cin, P, EP))

    def fold(w_io, bn):                      # w_io: (K, N) f32, scale folded on N
        gamma, beta, mean, var = bn
        scale = gamma / jnp.sqrt(var + eps)
        return w_io * scale[None, :], beta - mean * scale

    def pad_w(w, kp, npad):
        return jnp.pad(w, ((0, kp - w.shape[0]), (0, npad - w.shape[1]))
                       ).astype(jnp.bfloat16)

    def pad_b(b, npad):
        return jnp.pad(b, (0, npad - b.shape[0])).reshape(1, npad).astype(jnp.float32)

    w1, b1 = fold(params["w1_oihw"][:, :, 0, 0].T, params["bn1"])
    w3, b3 = fold(params["w3_oihw"][:, :, 0, 0].T, params["bn3"])

    g2, be2, m2, v2 = params["bn2"]
    s2 = g2 / jnp.sqrt(v2 + eps)
    b2 = be2 - m2 * s2
    w2 = jnp.transpose(params["w2_oihw"], (2, 3, 1, 0)) * s2[None, None, None, :]
    w2 = w2.reshape(9, P, P)                              # tap t = kh*3 + kw
    w2 = jnp.pad(w2, ((0, 0), (0, Pp - P), (0, Pp - P))).astype(jnp.bfloat16)

    pp = {"Cp": Cp, "Pp": Pp, "EPp": EPp,
          "w1": pad_w(w1, Cp, Pp), "b1": pad_b(b1, Pp),
          "w2": w2, "b2": pad_b(b2, Pp),
          "w3": pad_w(w3, Pp, EPp), "b3": pad_b(b3, EPp)}
    if "ws_oihw" in params:
        ws, bs = fold(params["ws_oihw"][:, :, 0, 0].T, params["bns"])
        pp["ws"] = pad_w(ws, Cp, EPp)
        pp["bs"] = pad_b(bs, EPp)
    return pp


def soft_bottleneck_forward(x_nchw, params, stride, tm=512, tn=512):
    """Pallas implementation of SoftBottleneck.forward (eval-mode BN)."""
    x = jnp.transpose(x_nchw, (0, 2, 3, 1))               # NCHW -> NHWC
    N, H, W, Cin = x.shape
    P = params["w1_oihw"].shape[0]
    EP = params["w3_oihw"].shape[0]
    pp = _prepare_params(params, Cin, P, EP)
    Cp, Pp, EPp = pp["Cp"], pp["Pp"], pp["EPp"]

    s = stride
    Ho = (H - 1) // s + 1
    Wo = (W - 1) // s + 1

    # Channel-pad once to a lane-dense multiple of 128 and cast to bf16.
    x_p = jnp.pad(x, ((0, 0), (0, 0), (0, 0), (0, Cp - Cin))).astype(jnp.bfloat16)

    # conv1 (1x1) + bn1 + relu: one fused MXU matmul over M = N*H*W rows.
    out1 = _fused_matmul(x_p.reshape(N * H * W, Cp), pp["w1"], pp["b1"],
                         apply_relu=True, out_dtype=jnp.bfloat16, tm=tm, tn=tn)
    out1 = out1.reshape(N, H, W, Pp)

    # conv2 (3x3, stride, pad=1) + bn2 + relu: 9 accumulated taps in one kernel.
    xph, Wh = _phase_split_pad(out1, s, Ho, Wo)
    Lo = Ho * Wh             # flattened rows per image (Wh - Wo junk cols per row)
    out2 = _conv3x3_bn_relu(xph, pp["w2"], pp["b2"], stride=s, Wh=Wh, Lo=Lo)
    out2 = out2.reshape(N * Lo, Pp)

    # Shortcut rows, laid out to match conv2's (Ho, Wh)-flattened output.
    xs = x_p[:, ::s, ::s, :]                               # (N, Ho, Wo, Cp)
    xs = jnp.pad(xs, ((0, 0), (0, 0), (0, Wh - Wo), (0, 0))).reshape(N * Lo, Cp)

    # conv3 (1x1) + bn3 + shortcut + relu, fully fused in one kernel.
    if stride != 1 or Cin != EP:     # projection shortcut: second dot fused in
        out = _fused_matmul(out2, pp["w3"], pp["b3"] + pp["bs"],
                            b=xs, wb=pp["ws"],
                            apply_relu=True, out_dtype=jnp.float32, tm=tm, tn=tn)
    else:                            # identity shortcut: residual add fused in
        out = _fused_matmul(out2, pp["w3"], pp["b3"], residual=xs,
                            apply_relu=True, out_dtype=jnp.float32, tm=tm, tn=tn)

    out = out.reshape(N, Ho, Wh, EPp)[:, :, :Wo, :EP]      # drop junk cols / pad chans
    return jnp.transpose(out, (0, 3, 1, 2))                # NHWC -> NCHW


# ----------------------------- reference (lax, f32) ------------------------- #

def _bn_fold(gamma, beta, mean, var, eps=1e-5):
    scale = gamma / jnp.sqrt(var + eps)
    return scale, beta - mean * scale


def _conv_ref(x_nhwc, w_oihw, stride, pad):
    w_hwio = jnp.transpose(w_oihw, (2, 3, 1, 0))
    return jax.lax.conv_general_dilated(
        x_nhwc, w_hwio, window_strides=(stride, stride),
        padding=[(pad, pad), (pad, pad)],
        dimension_numbers=("NHWC", "HWIO", "NHWC"))


def soft_bottleneck_reference(x_nchw, params, stride):
    x = jnp.transpose(x_nchw, (0, 2, 3, 1))
    Cin = x.shape[-1]
    EP = params["w3_oihw"].shape[0]

    def bn(y, p):
        s, b = _bn_fold(*p)
        return y * s + b

    out = jax.nn.relu(bn(_conv_ref(x, params["w1_oihw"], 1, 0), params["bn1"]))
    out = jax.nn.relu(bn(_conv_ref(out, params["w2_oihw"], stride, 1), params["bn2"]))
    out = bn(_conv_ref(out, params["w3_oihw"], 1, 0), params["bn3"])
    if stride != 1 or Cin != EP:
        sc = bn(_conv_ref(x, params["ws_oihw"], stride, 0), params["bns"])
    else:
        sc = x
    out = jax.nn.relu(out + sc)
    return jnp.transpose(out, (0, 3, 1, 2))


# --------------------------------- main ------------------------------------ #

def _make_bn_params(key, c):
    k1, k2, k3, k4 = jax.random.split(key, 4)
    gamma = 1.0 + 0.1 * jax.random.normal(k1, (c,), jnp.float32)
    beta = 0.1 * jax.random.normal(k2, (c,), jnp.float32)
    mean = 0.1 * jax.random.normal(k3, (c,), jnp.float32)
    var = jax.random.uniform(k4, (c,), jnp.float32, 0.5, 1.5)
    return (gamma, beta, mean, var)


if __name__ == "__main__":
    key = jax.random.PRNGKey(0)
    keys = jax.random.split(key, 20)
    fwd = jax.jit(soft_bottleneck_forward, static_argnums=(2,))
    expansion = 4

    # --- config 1: projection shortcut (stride=2, in_planes != expansion*planes)
    in_planes, planes, stride = 4, 4, 2
    N, H, W = 2, 16, 16
    params = {
        "w1_oihw": 0.2 * jax.random.normal(keys[0], (planes, in_planes, 1, 1), jnp.float32),
        "w2_oihw": 0.2 * jax.random.normal(keys[1], (planes, planes, 3, 3), jnp.float32),
        "w3_oihw": 0.2 * jax.random.normal(keys[2], (expansion * planes, planes, 1, 1), jnp.float32),
        "ws_oihw": 0.2 * jax.random.normal(keys[3], (expansion * planes, in_planes, 1, 1), jnp.float32),
        "bn1": _make_bn_params(keys[4], planes),
        "bn2": _make_bn_params(keys[5], planes),
        "bn3": _make_bn_params(keys[6], expansion * planes),
        "bns": _make_bn_params(keys[7], expansion * planes),
    }
    x = jax.random.normal(keys[8], (N, in_planes, H, W), jnp.float32)  # NCHW like PyTorch

    out = jax.block_until_ready(fwd(x, params, stride))
    ref = jax.block_until_ready(soft_bottleneck_reference(x, params, stride))
    # bf16 operands / intermediates -> bf16-level tolerance vs the f32 reference.
    np.testing.assert_allclose(np.asarray(out), np.asarray(ref), rtol=3e-2, atol=3e-2)

    # --- config 2: identity shortcut (stride=1, in_planes == expansion*planes)
    in_planes2, planes2, stride2 = 16, 4, 1
    N2, H2, W2 = 2, 8, 8
    params2 = {
        "w1_oihw": 0.2 * jax.random.normal(keys[9], (planes2, in_planes2, 1, 1), jnp.float32),
        "w2_oihw": 0.2 * jax.random.normal(keys[10], (planes2, planes2, 3, 3), jnp.float32),
        "w3_oihw": 0.2 * jax.random.normal(keys[11], (expansion * planes2, planes2, 1, 1), jnp.float32),
        "bn1": _make_bn_params(keys[12], planes2),
        "bn2": _make_bn_params(keys[13], planes2),
        "bn3": _make_bn_params(keys[14], expansion * planes2),
    }
    x2 = jax.random.normal(keys[15], (N2, in_planes2, H2, W2), jnp.float32)

    out2 = jax.block_until_ready(fwd(x2, params2, stride2))
    ref2 = jax.block_until_ready(soft_bottleneck_reference(x2, params2, stride2))
    np.testing.assert_allclose(np.asarray(out2), np.asarray(ref2), rtol=3e-2, atol=3e-2)

    print("KERNEL_OK")
</pallas_src>

<mosaic_0001>
module attributes {stable_mosaic.version = 11 : i64} {
  func.func @_mm_bias_act_kernel(%arg0: i32, %arg1: i32, %arg2: memref<512x128xbf16, #tpu.memory_space<vmem>>, %arg3: memref<128x128xbf16, #tpu.memory_space<vmem>>, %arg4: memref<1x128xf32, #tpu.memory_space<vmem>>, %arg5: memref<512x128xbf16, #tpu.memory_space<vmem>>) attributes {dimension_semantics = [#tpu.dimension_semantics<parallel>, #tpu.dimension_semantics<parallel>], iteration_bounds = array<i64: 1, 1>, scalar_prefetch = 0 : i64, scratch_operands = 0 : i64, tpu.core_type = #tpu.core_type<tc>, window_params = [{transform_indices = @transform_0, window_bounds = array<i64: 512, 128>}, {transform_indices = @transform_1, window_bounds = array<i64: 128, 128>}, {transform_indices = @transform_2, window_bounds = array<i64: 1, 128>}, {transform_indices = @transform_3, window_bounds = array<i64: 512, 128>}]} {
    %c0 = arith.constant 0 : index
    %c0_0 = arith.constant 0 : index
    %0 = vector.load %arg2[%c0, %c0_0] : memref<512x128xbf16, #tpu.memory_space<vmem>>, vector<512x128xbf16>
    %c0_1 = arith.constant 0 : index
    %c0_2 = arith.constant 0 : index
    %1 = vector.load %arg3[%c0_1, %c0_2] : memref<128x128xbf16, #tpu.memory_space<vmem>>, vector<128x128xbf16>
    %cst = arith.constant dense<0.000000e+00> : vector<512x128xf32>
    %2 = tpu.matmul %0, %1, %cst {dimension_numbers = #tpu.dot_dimension_numbers<[1], [0], [0], [1], [0, 0, 1, 1], [], []>} : vector<512x128xbf16>, vector<128x128xbf16>, vector<512x128xf32> -> vector<512x128xf32>
    %c0_3 = arith.constant 0 : index
    %c0_4 = arith.constant 0 : index
    %3 = vector.load %arg4[%c0_3, %c0_4] : memref<1x128xf32, #tpu.memory_space<vmem>>, vector<1x128xf32>
    %4 = vector.broadcast %3 : vector<1x128xf32> to vector<512x128xf32>
    %5 = arith.addf %2, %4 : vector<512x128xf32>
    %cst_5 = arith.constant 0.000000e+00 : f32
    %6 = vector.broadcast %cst_5 : f32 to vector<512x128xf32>
    %7 = arith.maximumf %5, %6 : vector<512x128xf32>
    %8 = arith.truncf %7 : vector<512x128xf32> to vector<512x128xbf16>
    %c0_6 = arith.constant 0 : index
    %c0_7 = arith.constant 0 : index
    %9 = vector.load %arg5[%c0_6, %c0_7] : memref<512x128xbf16, #tpu.memory_space<vmem>>, vector<512x128xbf16>
    tpu.vector_store %arg5[%c0_6, %c0_7], %8 {strides = array<i32>} : memref<512x128xbf16, #tpu.memory_space<vmem>>, vector<512x128xbf16>,
    return
  }
  func.func @transform_0(%arg0: i32, %arg1: i32) -> (i32, i32) {
    %c0_i32 = arith.constant 0 : i32
    %c0_i32_0 = arith.constant 0 : i32
    return %arg0, %c0_i32 : i32, i32
  }
  func.func @transform_1(%arg0: i32, %arg1: i32) -> (i32, i32) {
    %c0_i32 = arith.constant 0 : i32
    %c0_i32_0 = arith.constant 0 : i32
    return %c0_i32, %arg1 : i32, i32
  }
  func.func @transform_2(%arg0: i32, %arg1: i32) -> (i32, i32) {
    %c0_i32 = arith.constant 0 : i32
    %c0_i32_0 = arith.constant 0 : i32
    return %c0_i32, %arg1 : i32, i32
  }
  func.func @transform_3(%arg0: i32, %arg1: i32) -> (i32, i32) {
    %c0_i32 = arith.constant 0 : i32
    return %arg0, %arg1 : i32, i32
  }
}

module attributes {stable_mosaic.version = 11 : i64} {
  func.func @_conv3x3_taps_kernel(%arg0: i32, %arg1: i32, %arg2: memref<1x2x2x90x128xbf16, #tpu.memory_space<vmem>>, %arg3: memref<9x128x128xbf16, #tpu.memory_space<vmem>>, %arg4: memref<1x128xf32, #tpu.memory_space<vmem>>, %arg5: memref<1x72x128xbf16, #tpu.memory_space<vmem>>) attributes {dimension_semantics = [#tpu.dimension_semantics<parallel>, #tpu.dimension_semantics<parallel>], iteration_bounds = array<i64: 2, 1>, scalar_prefetch = 0 : i64, scratch_operands = 0 : i64, tpu.core_type = #tpu.core_type<tc>, window_params = [{transform_indices = @transform_0, window_bounds = array<i64: 1, 2, 2, 90, 128>}, {transform_indices = @transform_1, window_bounds = array<i64: 9, 128, 128>}, {transform_indices = @transform_2, window_bounds = array<i64: 1, 128>}, {transform_indices = @transform_3, window_bounds = array<i64: 1, 72, 128>}]} {
    %c0 = arith.constant 0 : index
    %c0_0 = arith.constant 0 : index
    %c0_1 = arith.constant 0 : index
    %c0_2 = arith.constant 0 : index
    %c0_3 = arith.constant 0 : index
    %0 = vector.load %arg2[%c0, %c0_0, %c0_1, %c0_2, %c0_3] : memref<1x2x2x90x128xbf16, #tpu.memory_space<vmem>>, vector<1x1x1x72x128xbf16>
    %1 = vector.shape_cast %0 : vector<1x1x1x72x128xbf16> to vector<72x128xbf16>
    %c0_4 = arith.constant 0 : index
    %c0_5 = arith.constant 0 : index
    %c0_6 = arith.constant 0 : index
    %2 = vector.load %arg3[%c0_4, %c0_5, %c0_6] : memref<9x128x128xbf16, #tpu.memory_space<vmem>>, vector<1x128x128xbf16>
    %3 = vector.shape_cast %2 : vector<1x128x128xbf16> to vector<128x128xbf16>
    %cst = arith.constant dense<0.000000e+00> : vector<72x128xf32>
    %4 = tpu.matmul %1, %3, %cst {dimension_numbers = #tpu.dot_dimension_numbers<[1], [0], [0], [1], [0, 0, 1, 1], [], []>} : vector<72x128xbf16>, vector<128x128xbf16>, vector<72x128xf32> -> vector<72x128xf32>
    %c0_7 = arith.constant 0 : index
    %c0_8 = arith.constant 0 : index
    %c1 = arith.constant 1 : index
    %c0_9 = arith.constant 0 : index
    %c0_10 = arith.constant 0 : index
    %5 = vector.load %arg2[%c0_7, %c0_8, %c1, %c0_9, %c0_10] : memref<1x2x2x90x128xbf16, #tpu.memory_space<vmem>>, vector<1x1x1x72x128xbf16>
    %6 = vector.shape_cast %5 : vector<1x1x1x72x128xbf16> to vector<72x128xbf16>
    %c1_11 = arith.constant 1 : index
    %c0_12 = arith.constant 0 : index
    %c0_13 = arith.constant 0 : index
    %7 = vector.load %arg3[%c1_11, %c0_12, %c0_13] : memref<9x128x128xbf16, #tpu.memory_space<vmem>>, vector<1x128x128xbf16>
    %8 = vector.shape_cast %7 : vector<1x128x128xbf16> to vector<128x128xbf16>
    %cst_14 = arith.constant dense<0.000000e+00> : vector<72x128xf32>
    %9 = tpu.matmul %6, %8, %cst_14 {dimension_numbers = #tpu.dot_dimension_numbers<[1], [0], [0], [1], [0, 0, 1, 1], [], []>} : vector<72x128xbf16>, vector<128x128xbf16>, vector<72x128xf32> -> vector<72x128xf32>
    %10 = arith.addf %4, %9 : vector<72x128xf32>
    %c0_15 = arith.constant 0 : index
    %c0_16 = arith.constant 0 : index
    %c0_17 = arith.constant 0 : index
    %c1_18 = arith.constant 1 : index
    %c0_19 = arith.constant 0 : index
    %11 = vector.load %arg2[%c0_15, %c0_16, %c0_17, %c1_18, %c0_19] : memref<1x2x2x90x128xbf16, #tpu.memory_space<vmem>>, vector<1x1x1x72x128xbf16>
    %12 = vector.shape_cast %11 : vector<1x1x1x72x128xbf16> to vector<72x128xbf16>
    %c2 = arith.constant 2 : index
    %c0_20 = arith.constant 0 : index
    %c0_21 = arith.constant 0 : index
    %13 = vector.load %arg3[%c2, %c0_20, %c0_21] : memref<9x128x128xbf16, #tpu.memory_space<vmem>>, vector<1x128x128xbf16>
    %14 = vector.shape_cast %13 : vector<1x128x128xbf16> to vector<128x128xbf16>
    %cst_22 = arith.constant dense<0.000000e+00> : vector<72x128xf32>
    %15 = tpu.matmul %12, %14, %cst_22 {dimension_numbers = #tpu.dot_dimension_numbers<[1], [0], [0], [1], [0, 0, 1, 1], [], []>} : vector<72x128xbf16>, vector<128x128xbf16>, vector<72x128xf32> -> vector<72x128xf32>
    %16 = arith.addf %10, %15 : vector<72x128xf32>
    %c0_23 = arith.constant 0 : index
    %c1_24 = arith.constant 1 : index
    %c0_25 = arith.constant 0 : index
    %c0_26 = arith.constant 0 : index
    %c0_27 = arith.constant 0 : index
    %17 = vector.load %arg2[%c0_23, %c1_24, %c0_25, %c0_26, %c0_27] : memref<1x2x2x90x128xbf16, #tpu.memory_space<vmem>>, vector<1x1x1x72x128xbf16>
    %18 = vector.shape_cast %17 : vector<1x1x1x72x128xbf16> to vector<72x128xbf16>
    %c3 = arith.constant 3 : index
    %c0_28 = arith.constant 0 : index
    %c0_29 = arith.constant 0 : index
    %19 = vector.load %arg3[%c3, %c0_28, %c0_29] : memref<9x128x128xbf16, #tpu.memory_space<vmem>>, vector<1x128x128xbf16>
    %20 = vector.shape_cast %19 : vector<1x128x128xbf16> to vector<128x128xbf16>
    %cst_30 = arith.constant dense<0.000000e+00> : vector<72x128xf32>
    %21 = tpu.matmul %18, %20, %cst_30 {dimension_numbers = #tpu.dot_dimension_numbers<[1], [0], [0], [1], [0, 0, 1, 1], [], []>} : vector<72x128xbf16>, vector<128x128xbf16>, vector<72x128xf32> -> vector<72x128xf32>
    %22 = arith.addf %16, %21 : vector<72x128xf32>
    %c0_31 = arith.constant 0 : index
    %c1_32 = arith.constant 1 : index
    %c1_33 = arith.constant 1 : index
    %c0_34 = arith.constant 0 : index
    %c0_35 = arith.constant 0 : index
    %23 = vector.load %arg2[%c0_31, %c1_32, %c1_33, %c0_34, %c0_35] : memref<1x2x2x90x128xbf16, #tpu.memory_space<vmem>>, vector<1x1x1x72x128xbf16>
    %24 = vector.shape_cast %23 : vector<1x1x1x72x128xbf16> to vector<72x128xbf16>
    %c4 = arith.constant 4 : index
    %c0_36 = arith.constant 0 : index
    %c0_37 = arith.constant 0 : index
    %25 = vector.load %arg3[%c4, %c0_36, %c0_37] : memref<9x128x128xbf16, #tpu.memory_space<vmem>>, vector<1x128x128xbf16>
    %26 = vector.shape_cast %25 : vector<1x128x128xbf16> to vector<128x128xbf16>
    %cst_38 = arith.constant dense<0.000000e+00> : vector<72x128xf32>
    %27 = tpu.matmul %24, %26, %cst_38 {dimension_numbers = #tpu.dot_dimension_numbers<[1], [0], [0], [1], [0, 0, 1, 1], [], []>} : vector<72x128xbf16>, vector<128x128xbf16>, vector<72x128xf32> -> vector<72x128xf32>
    %28 = arith.addf %22, %27 : vector<72x128xf32>
    %c0_39 = arith.constant 0 : index
    %c1_40 = arith.constant 1 : index
    %c0_41 = arith.constant 0 : index
    %c1_42 = arith.constant 1 : index
    %c0_43 = arith.constant 0 : index
    %29 = vector.load %arg2[%c0_39, %c1_40, %c0_41, %c1_42, %c0_43] : memref<1x2x2x90x128xbf16, #tpu.memory_space<vmem>>, vector<1x1x1x72x128xbf16>
    %30 = vector.shape_cast %29 : vector<1x1x1x72x128xbf16> to vector<72x128xbf16>
    %c5 = arith.constant 5 : index
    %c0_44 = arith.constant 0 : index
    %c0_45 = arith.constant 0 : index
    %31 = vector.load %arg3[%c5, %c0_44, %c0_45] : memref<9x128x128xbf16, #tpu.memory_space<vmem>>, vector<1x128x128xbf16>
    %32 = vector.shape_cast %31 : vector<1x128x128xbf16> to vector<128x128xbf16>
    %cst_46 = arith.constant dense<0.000000e+00> : vector<72x128xf32>
    %33 = tpu.matmul %30, %32, %cst_46 {dimension_numbers = #tpu.dot_dimension_numbers<[1], [0], [0], [1], [0, 0, 1, 1], [], []>} : vector<72x128xbf16>, vector<128x128xbf16>, vector<72x128xf32> -> vector<72x128xf32>
    %34 = arith.addf %28, %33 : vector<72x128xf32>
    %c0_47 = arith.constant 0 : index
    %c0_48 = arith.constant 0 : index
    %c0_49 = arith.constant 0 : index
    %c9 = arith.constant 9 : index
    %c0_50 = arith.constant 0 : index
    %35 = vector.load %arg2[%c0_47, %c0_48, %c0_49, %c9, %c0_50] : memref<1x2x2x90x128xbf16, #tpu.memory_space<vmem>>, vector<1x1x1x72x128xbf16>
    %36 = vector.shape_cast %35 : vector<1x1x1x72x128xbf16> to vector<72x128xbf16>
    %c6 = arith.constant 6 : index
    %c0_51 = arith.constant 0 : index
    %c0_52 = arith.constant 0 : index
    %37 = vector.load %arg3[%c6, %c0_51, %c0_52] : memref<9x128x128xbf16, #tpu.memory_space<vmem>>, vector<1x128x128xbf16>
    %38 = vector.shape_cast %37 : vector<1x128x128xbf16> to vector<128x128xbf16>
    %cst_53 = arith.constant dense<0.000000e+00> : vector<72x128xf32>
    %39 = tpu.matmul %36, %38, %cst_53 {dimension_numbers = #tpu.dot_dimension_numbers<[1], [0], [0], [1], [0, 0, 1, 1], [], []>} : vector<72x128xbf16>, vector<128x128xbf16>, vector<72x128xf32> -> vector<72x128xf32>
    %40 = arith.addf %34, %39 : vector<72x128xf32>
    %c0_54 = arith.constant 0 : index
    %c0_55 = arith.constant 0 : index
    %c1_56 = arith.constant 1 : index
    %c9_57 = arith.constant 9 : index
    %c0_58 = arith.constant 0 : index
    %41 = vector.load %arg2[%c0_54, %c0_55, %c1_56, %c9_57, %c0_58] : memref<1x2x2x90x128xbf16, #tpu.memory_space<vmem>>, vector<1x1x1x72x128xbf16>
    %42 = vector.shape_cast %41 : vector<1x1x1x72x128xbf16> to vector<72x128xbf16>
    %c7 = arith.constant 7 : index
    %c0_59 = arith.constant 0 : index
    %c0_60 = arith.constant 0 : index
    %43 = vector.load %arg3[%c7, %c0_59, %c0_60] : memref<9x128x128xbf16, #tpu.memory_space<vmem>>, vector<1x128x128xbf16>
    %44 = vector.shape_cast %43 : vector<1x128x128xbf16> to vector<128x128xbf16>
    %cst_61 = arith.constant dense<0.000000e+00> : vector<72x128xf32>
    %45 = tpu.matmul %42, %44, %cst_61 {dimension_numbers = #tpu.dot_dimension_numbers<[1], [0], [0], [1], [0, 0, 1, 1], [], []>} : vector<72x128xbf16>, vector<128x128xbf16>, vector<72x128xf32> -> vector<72x128xf32>
    %46 = arith.addf %40, %45 : vector<72x128xf32>
    %c0_62 = arith.constant 0 : index
    %c0_63 = arith.constant 0 : index
    %c0_64 = arith.constant 0 : index
    %c10 = arith.constant 10 : index
    %c0_65 = arith.constant 0 : index
    %47 = vector.load %arg2[%c0_62, %c0_63, %c0_64, %c10, %c0_65] : memref<1x2x2x90x128xbf16, #tpu.memory_space<vmem>>, vector<1x1x1x72x128xbf16>
    %48 = vector.shape_cast %47 : vector<1x1x1x72x128xbf16> to vector<72x128xbf16>
    %c8 = arith.constant 8 : index
    %c0_66 = arith.constant 0 : index
    %c0_67 = arith.constant 0 : index
    %49 = vector.load %arg3[%c8, %c0_66, %c0_67] : memref<9x128x128xbf16, #tpu.memory_space<vmem>>, vector<1x128x128xbf16>
    %50 = vector.shape_cast %49 : vector<1x128x128xbf16> to vector<128x128xbf16>
    %cst_68 = arith.constant dense<0.000000e+00> : vector<72x128xf32>
    %51 = tpu.matmul %48, %50, %cst_68 {dimension_numbers = #tpu.dot_dimension_numbers<[1], [0], [0], [1], [0, 0, 1, 1], [], []>} : vector<72x128xbf16>, vector<128x128xbf16>, vector<72x128xf32> -> vector<72x128xf32>
    %52 = arith.addf %46, %51 : vector<72x128xf32>
    %c0_69 = arith.constant 0 : index
    %c0_70 = arith.constant 0 : index
    %53 = vector.load %arg4[%c0_69, %c0_70] : memref<1x128xf32, #tpu.memory_space<vmem>>, vector<1x128xf32>
    %54 = vector.broadcast %53 : vector<1x128xf32> to vector<72x128xf32>
    %55 = arith.addf %52, %54 : vector<72x128xf32>
    %cst_71 = arith.constant 0.000000e+00 : f32
    %56 = vector.broadcast %cst_71 : f32 to vector<72x128xf32>
    %57 = arith.maximumf %55, %56 : vector<72x128xf32>
    %58 = arith.truncf %57 : vector<72x128xf32> to vector<72x128xbf16>
    %c0_72 = arith.constant 0 : index
    %c0_73 = arith.constant 0 : index
    %c0_74 = arith.constant 0 : index
    %59 = vector.load %arg5[%c0_72, %c0_73, %c0_74] : memref<1x72x128xbf16, #tpu.memory_space<vmem>>, vector<1x72x128xbf16>
    %60 = vector.shape_cast %59 : vector<1x72x128xbf16> to vector<72x128xbf16>
    %61 = vector.shape_cast %58 : vector<72x128xbf16> to vector<1x72x128xbf16>
    tpu.vector_store %arg5[%c0_72, %c0_73, %c0_74], %61 {strides = array<i32>} : memref<1x72x128xbf16, #tpu.memory_space<vmem>>, vector<1x72x128xbf16>,
    return
  }
  func.func @transform_0(%arg0: i32, %arg1: i32) -> (i32, i32, i32, i32, i32) {
    %c0_i32 = arith.constant 0 : i32
    %c0_i32_0 = arith.constant 0 : i32
    %c0_i32_1 = arith.constant 0 : i32
    %c0_i32_2 = arith.constant 0 : i32
    %c0_i32_3 = arith.constant 0 : i32
    return %arg0, %c0_i32, %c0_i32_0, %c0_i32_1, %c0_i32_2 : i32, i32, i32, i32, i32
  }
  func.func @transform_1(%arg0: i32, %arg1: i32) -> (i32, i32, i32) {
    %c0_i32 = arith.constant 0 : i32
    %c0_i32_0 = arith.constant 0 : i32
    %c0_i32_1 = arith.constant 0 : i32
    return %c0_i32, %c0_i32_0, %arg1 : i32, i32, i32
  }
  func.func @transform_2(%arg0: i32, %arg1: i32) -> (i32, i32) {
    %c0_i32 = arith.constant 0 : i32
    %c0_i32_0 = arith.constant 0 : i32
    return %c0_i32, %arg1 : i32, i32
  }
  func.func @transform_3(%arg0: i32, %arg1: i32) -> (i32, i32, i32) {
    %c0_i32 = arith.constant 0 : i32
    %c0_i32_0 = arith.constant 0 : i32
    return %arg0, %c0_i32, %arg1 : i32, i32, i32
  }
}

module attributes {stable_mosaic.version = 11 : i64} {
  func.func @_dual_mm_bias_act_kernel(%arg0: i32, %arg1: i32, %arg2: memref<144x128xbf16, #tpu.memory_space<vmem>>, %arg3: memref<128x128xbf16, #tpu.memory_space<vmem>>, %arg4: memref<144x128xbf16, #tpu.memory_space<vmem>>, %arg5: memref<128x128xbf16, #tpu.memory_space<vmem>>, %arg6: memref<1x128xf32, #tpu.memory_space<vmem>>, %arg7: memref<144x128xf32, #tpu.memory_space<vmem>>) attributes {dimension_semantics = [#tpu.dimension_semantics<parallel>, #tpu.dimension_semantics<parallel>], iteration_bounds = array<i64: 1, 1>, scalar_prefetch = 0 : i64, scratch_operands = 0 : i64, tpu.core_type = #tpu.core_type<tc>, window_params = [{transform_indices = @transform_0, window_bounds = array<i64: 144, 128>}, {transform_indices = @transform_1, window_bounds = array<i64: 128, 128>}, {transform_indices = @transform_2, window_bounds = array<i64: 144, 128>}, {transform_indices = @transform_3, window_bounds = array<i64: 128, 128>}, {transform_indices = @transform_4, window_bounds = array<i64: 1, 128>}, {transform_indices = @transform_5, window_bounds = array<i64: 144, 128>}]} {
    %c0 = arith.constant 0 : index
    %c0_0 = arith.constant 0 : index
    %0 = vector.load %arg2[%c0, %c0_0] : memref<144x128xbf16, #tpu.memory_space<vmem>>, vector<144x128xbf16>
    %c0_1 = arith.constant 0 : index
    %c0_2 = arith.constant 0 : index
    %1 = vector.load %arg3[%c0_1, %c0_2] : memref<128x128xbf16, #tpu.memory_space<vmem>>, vector<128x128xbf16>
    %cst = arith.constant dense<0.000000e+00> : vector<144x128xf32>
    %2 = tpu.matmul %0, %1, %cst {dimension_numbers = #tpu.dot_dimension_numbers<[1], [0], [0], [1], [0, 0, 1, 1], [], []>} : vector<144x128xbf16>, vector<128x128xbf16>, vector<144x128xf32> -> vector<144x128xf32>
    %c0_3 = arith.constant 0 : index
    %c0_4 = arith.constant 0 : index
    %3 = vector.load %arg4[%c0_3, %c0_4] : memref<144x128xbf16, #tpu.memory_space<vmem>>, vector<144x128xbf16>
    %c0_5 = arith.constant 0 : index
    %c0_6 = arith.constant 0 : index
    %4 = vector.load %arg5[%c0_5, %c0_6] : memref<128x128xbf16, #tpu.memory_space<vmem>>, vector<128x128xbf16>
    %cst_7 = arith.constant dense<0.000000e+00> : vector<144x128xf32>
    %5 = tpu.matmul %3, %4, %cst_7 {dimension_numbers = #tpu.dot_dimension_numbers<[1], [0], [0], [1], [0, 0, 1, 1], [], []>} : vector<144x128xbf16>, vector<128x128xbf16>, vector<144x128xf32> -> vector<144x128xf32>
    %6 = arith.addf %2, %5 : vector<144x128xf32>
    %c0_8 = arith.constant 0 : index
    %c0_9 = arith.constant 0 : index
    %7 = vector.load %arg6[%c0_8, %c0_9] : memref<1x128xf32, #tpu.memory_space<vmem>>, vector<1x128xf32>
    %8 = vector.broadcast %7 : vector<1x128xf32> to vector<144x128xf32>
    %9 = arith.addf %6, %8 : vector<144x128xf32>
    %cst_10 = arith.constant 0.000000e+00 : f32
    %10 = vector.broadcast %cst_10 : f32 to vector<144x128xf32>
    %11 = arith.maximumf %9, %10 : vector<144x128xf32>
    %c0_11 = arith.constant 0 : index
    %c0_12 = arith.constant 0 : index
    %12 = vector.load %arg7[%c0_11, %c0_12] : memref<144x128xf32, #tpu.memory_space<vmem>>, vector<144x128xf32>
    tpu.vector_store %arg7[%c0_11, %c0_12], %11 {strides = array<i32>} : memref<144x128xf32, #tpu.memory_space<vmem>>, vector<144x128xf32>,
    return
  }
  func.func @transform_0(%arg0: i32, %arg1: i32) -> (i32, i32) {
    %c0_i32 = arith.constant 0 : i32
    %c0_i32_0 = arith.constant 0 : i32
    return %arg0, %c0_i32 : i32, i32
  }
  func.func @transform_1(%arg0: i32, %arg1: i32) -> (i32, i32) {
    %c0_i32 = arith.constant 0 : i32
    %c0_i32_0 = arith.constant 0 : i32
    return %c0_i32, %arg1 : i32, i32
  }
  func.func @transform_2(%arg0: i32, %arg1: i32) -> (i32, i32) {
    %c0_i32 = arith.constant 0 : i32
    %c0_i32_0 = arith.constant 0 : i32
    return %arg0, %c0_i32 : i32, i32
  }
  func.func @transform_3(%arg0: i32, %arg1: i32) -> (i32, i32) {
    %c0_i32 = arith.constant 0 : i32
    %c0_i32_0 = arith.constant 0 : i32
    return %c0_i32, %arg1 : i32, i32
  }
  func.func @transform_4(%arg0: i32, %arg1: i32) -> (i32, i32) {
    %c0_i32 = arith.constant 0 : i32
    %c0_i32_0 = arith.constant 0 : i32
    return %c0_i32, %arg1 : i32, i32
  }
  func.func @transform_5(%arg0: i32, %arg1: i32) -> (i32, i32) {
    %c0_i32 = arith.constant 0 : i32
    return %arg0, %arg1 : i32, i32
  }
}

</mosaic_0001>

<bundles_post_ra>
// kernel: soft_bottleneck_forward.3
= control target key start
LH: loop header
LB: loop body
LE: loop exit
PB: predicated region body
PF: predicated region fallthrough
CT: control target
= control target key end

     0   :  { %s1860_s1 = inlined_call_operand.vmem [shape: bf16[128,128], index: 1, kind: input, shape index: {}]   ;;  %s1861_s0 = inlined_call_operand.vmem [shape: bf16[512,128], index: 0, kind: input, shape index: {}]   ;;  %s1862_s2 = inlined_call_operand.vmem [shape: f32[1,128], index: 2, kind: input, shape index: {}]   ;;  %s1863_s3 = inlined_call_operand.vmem [shape: bf16[512,128], index: 3, kind: output, shape index: {}]  }
   0x1   :  { %v1515_v0 = vld [vmem:[%s1860_s1 + $0x38] sm:$0xff]   ;;  %v1516_v1 = vld [vmem:[%s1860_s1 + $0x30] sm:$0xff]   ;;  %v1517_v2 = vld [vmem:[%s1860_s1 + $0x28] sm:$0xff]  }
   0x2   :  { %1419 = vmatprep.subr.bf16.mxu0 %v1515_v0  ;;  %1499 = vmatprep.subr.bf16.mxu1 %v1515_v0  ;;  %v1518_v3 = vld [vmem:[%s1860_s1 + $0x20] sm:$0xff]   ;;  %v1519_v6 = vld [vmem:[%s1860_s1 + $0x18] sm:$0xff]   ;;  %v1520_v7 = vld [vmem:[%s1860_s1 + $0x10] sm:$0xff]  }
   0x3   :  { %1420 = vmatpush3.bf16.msra.mxu0 %v1515_v0  ;;  %1507 = vmatpush3.bf16.msra.mxu1 %v1515_v0  ;;  %v1523_v4 = vld [vmem:[%s1861_s0] sm:$0xff]   ;;  %v1521_v8 = vld [vmem:[%s1860_s1 + $0x8] sm:$0xff]   ;;  %v1527_v12 = vld [vmem:[%s1861_s0 + $0x10] sm:$0xff]  }
   0x4   :  { %1421 = vmatprep.subr.bf16.mxu0 %v1516_v1  ;;  %1500 = vmatprep.subr.bf16.mxu1 %v1516_v1  ;;  %v1524_v5 = vld [vmem:[%s1861_s0 + $0x80] sm:$0xff]   ;;  %v1525_v10 = vld [vmem:[%s1861_s0 + $0x8] sm:$0xff]   ;;  %v1528_v13 = vld [vmem:[%s1861_s0 + $0x90] sm:$0xff]  }
   0x5   :  { %1435 = vmatprep.mubr.bf16.mxu0 %v1523_v4  ;;  %1467 = vmatprep.mubr.bf16.mxu1 %v1524_v5  ;;  %v1522_v9 = vld [vmem:[%s1860_s1] sm:$0xff]   ;;  %v1526_v11 = vld [vmem:[%s1861_s0 + $0x88] sm:$0xff]   ;;  %v1529_v14 = vld [vmem:[%s1861_s0 + $0x18] sm:$0xff]  }
   0x6   :  { %v1530_v15 = vld [vmem:[%s1861_s0 + $0x98] sm:$0xff]   ;;  %v1531_v16 = vld [vmem:[%s1861_s0 + $0x20] sm:$0xff]   ;;  %v1533_v18 = vld [vmem:[%s1861_s0 + $0x28] sm:$0xff]  }
   0x7   :  { %1422 = vmatpush3.bf16.msra.mxu0 %v1516_v1  ;;  %1508 = vmatpush3.bf16.msra.mxu1 %v1516_v1  ;;  %v1532_v17 = vld [vmem:[%s1861_s0 + $0xa0] sm:$0xff]   ;;  %v1534_v19 = vld [vmem:[%s1861_s0 + $0xa8] sm:$0xff]   ;;  %v1535_v20 = vld [vmem:[%s1861_s0 + $0x30] sm:$0xff]  }
   0x8   :  { %1423 = vmatprep.subr.bf16.mxu0 %v1517_v2  ;;  %1501 = vmatprep.subr.bf16.mxu1 %v1517_v2  ;;  %v1536_v21 = vld [vmem:[%s1861_s0 + $0xb0] sm:$0xff]   ;;  %v1537_v22 = vld [vmem:[%s1861_s0 + $0x38] sm:$0xff]   ;;  %v1539_v24 = vld [vmem:[%s1861_s0 + $0x40] sm:$0xff]  }
   0x9   :  { %v1538_v23 = vld [vmem:[%s1861_s0 + $0xb8] sm:$0xff]   ;;  %v1540_v25 = vld [vmem:[%s1861_s0 + $0xc0] sm:$0xff]   ;;  %v1541_v26 = vld [vmem:[%s1861_s0 + $0x48] sm:$0xff]  }
   0xa   :  { %v1542_v27 = vld [vmem:[%s1861_s0 + $0xc8] sm:$0xff]   ;;  %v1543_v28 = vld [vmem:[%s1861_s0 + $0x50] sm:$0xff]   ;;  %v1545_v30 = vld [vmem:[%s1861_s0 + $0x58] sm:$0xff]  }
   0xb   :  { %1424 = vmatpush3.bf16.msra.mxu0 %v1517_v2  ;;  %1509 = vmatpush3.bf16.msra.mxu1 %v1517_v2  ;;  %v1544_v29 = vld [vmem:[%s1861_s0 + $0xd0] sm:$0xff]   ;;  %v1546_v31 = vld [vmem:[%s1861_s0 + $0xd8] sm:$0xff]   ;;  %v1547_v32 = vld [vmem:[%s1861_s0 + $0x60] sm:$0xff]  }
   0xc   :  { %1425 = vmatprep.subr.bf16.mxu0 %v1518_v3  ;;  %1502 = vmatprep.subr.bf16.mxu1 %v1518_v3  ;;  %v1548_v33 = vld [vmem:[%s1861_s0 + $0xe0] sm:$0xff]   ;;  %v1549_v34 = vld [vmem:[%s1861_s0 + $0x68] sm:$0xff]   ;;  %v1551_v36 = vld [vmem:[%s1861_s0 + $0x70] sm:$0xff]  }
   0xd   :  { %v1550_v35 = vld [vmem:[%s1861_s0 + $0xe8] sm:$0xff]   ;;  %v1552_v37 = vld [vmem:[%s1861_s0 + $0xf0] sm:$0xff]   ;;  %v1553_v38 = vld [vmem:[%s1861_s0 + $0x78] sm:$0xff]  }
   0xe   :  { %v1554_v39 = vld [vmem:[%s1861_s0 + $0xf8] sm:$0xff]   ;;  %v1698_v40 = vld [vmem:[%s1862_s2] ss:$0 sm:$0xff] }
   0xf   :  { %1426 = vmatpush3.bf16.msra.mxu0 %v1518_v3  ;;  %1510 = vmatpush3.bf16.msra.mxu1 %v1518_v3 }
  0x10   :  { %1427 = vmatprep.subr.bf16.mxu0 %v1519_v6  ;;  %1503 = vmatprep.subr.bf16.mxu1 %v1519_v6 }
  0x13   :  { %1428 = vmatpush3.bf16.msra.mxu0 %v1519_v6  ;;  %1511 = vmatpush3.bf16.msra.mxu1 %v1519_v6 }
  0x14   :  { %1429 = vmatprep.subr.bf16.mxu0 %v1520_v7  ;;  %1504 = vmatprep.subr.bf16.mxu1 %v1520_v7 }
  0x17   :  { %1430 = vmatpush3.bf16.msra.mxu0 %v1520_v7  ;;  %1512 = vmatpush3.bf16.msra.mxu1 %v1520_v7 }
  0x18   :  { %1431 = vmatprep.subr.bf16.mxu0 %v1521_v8  ;;  %1505 = vmatprep.subr.bf16.mxu1 %v1521_v8 }
  0x1b   :  { %1432 = vmatpush3.bf16.msra.mxu0 %v1521_v8  ;;  %1513 = vmatpush3.bf16.msra.mxu1 %v1521_v8 }
  0x1c   :  { %1433 = vmatprep.subr.bf16.mxu0 %v1522_v9  ;;  %1506 = vmatprep.subr.bf16.mxu1 %v1522_v9 }
  0x1f   :  { %1434 = vmatpush3.bf16.msra.mxu0 %v1522_v9  ;;  %1514 = vmatpush3.bf16.msra.mxu1 %v1522_v9 }
  0x22   :  { %1436 = vmatmul.mubr.bf16.vlgmr.msra.gmra.mxu0 %v1525_v10  ;;  %1468 = vmatmul.mubr.bf16.vlgmr.msra.gmra.mxu1 %v1526_v11 }
  0x23   :  { %1439 = vmatprep.mubr.bf16.mxu0 %v1527_v12  ;;  %1471 = vmatprep.mubr.bf16.mxu1 %v1528_v13 }
  0x2a   :  { %1440 = vmatmul.mubr.bf16.gmra.mxu0 %v1529_v14  ;;  %1472 = vmatmul.mubr.bf16.gmra.mxu1 %v1530_v15 }
  0x2b   :  { %1443 = vmatprep.mubr.bf16.mxu0 %v1531_v16  ;;  %1475 = vmatprep.mubr.bf16.mxu1 %v1532_v17 }
  0x32   :  { %1444 = vmatmul.mubr.bf16.gmra.mxu0 %v1533_v18  ;;  %1476 = vmatmul.mubr.bf16.gmra.mxu1 %v1534_v19 }
  0x33   :  { %1447 = vmatprep.mubr.bf16.mxu0 %v1535_v20  ;;  %1479 = vmatprep.mubr.bf16.mxu1 %v1536_v21 }
  0x3a   :  { %1448 = vmatmul.mubr.bf16.gmra.mxu0 %v1537_v22  ;;  %1480 = vmatmul.mubr.bf16.gmra.mxu1 %v1538_v23 }
  0x3b   :  { %1451 = vmatprep.mubr.bf16.mxu0 %v1539_v24  ;;  %1483 = vmatprep.mubr.bf16.mxu1 %v1540_v25 }
  0x42   :  { %1452 = vmatmul.mubr.bf16.gmra.mxu0 %v1541_v26  ;;  %1484 = vmatmul.mubr.bf16.gmra.mxu1 %v1542_v27 }
  0x43   :  { %1455 = vmatprep.mubr.bf16.mxu0 %v1543_v28  ;;  %1487 = vmatprep.mubr.bf16.mxu1 %v1544_v29 }
  0x4a   :  { %1456 = vmatmul.mubr.bf16.gmra.mxu0 %v1545_v30  ;;  %1488 = vmatmul.mubr.bf16.gmra.mxu1 %v1546_v31 }
  0x4b   :  { %1459 = vmatprep.mubr.bf16.mxu0 %v1547_v32  ;;  %1491 = vmatprep.mubr.bf16.mxu1 %v1548_v33 }
  0x52   :  { %1460 = vmatmul.mubr.bf16.gmra.mxu0 %v1549_v34  ;;  %1492 = vmatmul.mubr.bf16.gmra.mxu1 %v1550_v35 }
  0x53   :  { %1463 = vmatprep.mubr.bf16.mxu0 %v1551_v36  ;;  %1495 = vmatprep.mubr.bf16.mxu1 %v1552_v37 }
  0x5a   :  { %1464 = vmatmul.mubr.bf16.gmra.mxu0 %v1553_v38  ;;  %1496 = vmatmul.mubr.bf16.gmra.mxu1 %v1554_v39 }
  0xe2   :  { %v1437_v41 = vpop.f32.mrf.mxu0  ;;  %v1469_v42 = vpop.f32.mrf.mxu1 }
  0xe3   :  { %v385_v43 = vadd.f32 %v1437_v41, %v1698_v40  ;;  %v513_v44 = vadd.f32 %v1469_v42, %v1698_v40 }
  0xe4   :  { %v376_v45 = vpop.f32.mrf.mxu0  ;;  %v504_v46 = vpop.f32.mrf.mxu1 }
  0xe5   :  { %v377_v47 = vadd.f32 %v1698_v40, %v376_v45  ;;  %v505_v48 = vadd.f32 %v1698_v40, %v504_v46  ;;  %v633_v53 = vmax.f32 %v385_v43, 0.0  ;;  %v665_v54 = vmax.f32 %v513_v44, 0.0 }
  0xe6   :  { %v1438_v49 = vpop.f32.mrf.mxu0  ;;  %v1470_v50 = vpop.f32.mrf.mxu1 }
  0xe7   :  { %v388_v51 = vadd.f32 %v1438_v49, %v1698_v40  ;;  %v516_v52 = vadd.f32 %v1470_v50, %v1698_v40  ;;  %v631_v61 = vmax.f32 %v377_v47, 0.0  ;;  %v663_v62 = vmax.f32 %v505_v48, 0.0 }
  0xe8   :  { %v379_v55 = vpop.f32.mrf.mxu0  ;;  %v507_v56 = vpop.f32.mrf.mxu1 }
  0xe9   :  { %v634_v57 = vmax.f32 %v388_v51, 0.0  ;;  %v666_v58 = vmax.f32 %v516_v52, 0.0  ;;  %v380_v59 = vadd.f32 %v1698_v40, %v379_v55  ;;  %v508_v60 = vadd.f32 %v1698_v40, %v507_v56 }
  0xea   :  { %v1441_v63 = vpop.f32.mrf.mxu0  ;;  %v1473_v0 = vpop.f32.mrf.mxu1 }
  0xeb   :  { %v1196_v1 = vpack.c.bf16 %v634_v57, %v633_v53  ;;  %v1276_v2 = vpack.c.bf16 %v666_v58, %v665_v54  ;;  %v632_v3 = vmax.f32 %v380_v59, 0.0  ;;  %v664_v4 = vmax.f32 %v508_v60, 0.0 }
  0xec   :  { %v401_v5 = vadd.f32 %v1441_v63, %v1698_v40  ;;  %v529_v6 = vadd.f32 %v1473_v0, %v1698_v40  ;;  %v392_v7 = vpop.f32.mrf.mxu0  ;;  %v520_v8 = vpop.f32.mrf.mxu1 }
  0xed   :  { %1348 = vst [vmem:[%s1863_s3 + $0x8] sm:$0xff] %v1196_v1   ;;  %1364 = vst [vmem:[%s1863_s3 + $0x88] sm:$0xff] %v1276_v2   ;;  %v1191_v9 = vpack.c.bf16 %v632_v3, %v631_v61  ;;  %v1271_v10 = vpack.c.bf16 %v664_v4, %v663_v62  ;;  %v393_v11 = vadd.f32 %v1698_v40, %v392_v7 }
  0xee   :  { %v521_v12 = vadd.f32 %v1698_v40, %v520_v8  ;;  %v1442_v13 = vpop.f32.mrf.mxu0  ;;  %v1474_v14 = vpop.f32.mrf.mxu1  ;;  %v637_v17 = vmax.f32 %v401_v5, 0.0  ;;  %v669_v18 = vmax.f32 %v529_v6, 0.0 }
  0xef   :  { %1192 = vst [vmem:[%s1863_s3] sm:$0xff] %v1191_v9   ;;  %1363 = vst [vmem:[%s1863_s3 + $0x80] sm:$0xff] %v1271_v10   ;;  %v404_v15 = vadd.f32 %v1442_v13, %v1698_v40  ;;  %v532_v16 = vadd.f32 %v1474_v14, %v1698_v40  ;;  %v635_v25 = vmax.f32 %v393_v11, 0.0 }
  0xf0   :  { %v395_v19 = vpop.f32.mrf.mxu0  ;;  %v523_v20 = vpop.f32.mrf.mxu1  ;;  %v667_v26 = vmax.f32 %v521_v12, 0.0 }
  0xf1   :  { %v638_v21 = vmax.f32 %v404_v15, 0.0  ;;  %v670_v22 = vmax.f32 %v532_v16, 0.0  ;;  %v396_v23 = vadd.f32 %v1698_v40, %v395_v19  ;;  %v524_v24 = vadd.f32 %v1698_v40, %v523_v20 }
  0xf2   :  { %v1445_v27 = vpop.f32.mrf.mxu0  ;;  %v1477_v28 = vpop.f32.mrf.mxu1 }
  0xf3   :  { %v1206_v29 = vpack.c.bf16 %v638_v21, %v637_v17  ;;  %v1286_v30 = vpack.c.bf16 %v670_v22, %v669_v18  ;;  %v636_v31 = vmax.f32 %v396_v23, 0.0  ;;  %v668_v32 = vmax.f32 %v524_v24, 0.0 }
  0xf4   :  { %v417_v33 = vadd.f32 %v1445_v27, %v1698_v40  ;;  %v545_v34 = vadd.f32 %v1477_v28, %v1698_v40  ;;  %v408_v35 = vpop.f32.mrf.mxu0  ;;  %v536_v36 = vpop.f32.mrf.mxu1 }
  0xf5   :  { %1350 = vst [vmem:[%s1863_s3 + $0x18] sm:$0xff] %v1206_v29   ;;  %1366 = vst [vmem:[%s1863_s3 + $0x98] sm:$0xff] %v1286_v30   ;;  %v1201_v37 = vpack.c.bf16 %v636_v31, %v635_v25  ;;  %v1281_v38 = vpack.c.bf16 %v668_v32, %v667_v26  ;;  %v409_v39 = vadd.f32 %v1698_v40, %v408_v35 }
  0xf6   :  { %v537_v41 = vadd.f32 %v1698_v40, %v536_v36  ;;  %v1446_v42 = vpop.f32.mrf.mxu0  ;;  %v1478_v43 = vpop.f32.mrf.mxu1  ;;  %v641_v46 = vmax.f32 %v417_v33, 0.0  ;;  %v673_v47 = vmax.f32 %v545_v34, 0.0 }
  0xf7   :  { %1349 = vst [vmem:[%s1863_s3 + $0x10] sm:$0xff] %v1201_v37   ;;  %1365 = vst [vmem:[%s1863_s3 + $0x90] sm:$0xff] %v1281_v38   ;;  %v420_v44 = vadd.f32 %v1446_v42, %v1698_v40  ;;  %v548_v45 = vadd.f32 %v1478_v43, %v1698_v40  ;;  %v639_v54 = vmax.f32 %v409_v39, 0.0 }
  0xf8   :  { %v411_v48 = vpop.f32.mrf.mxu0  ;;  %v539_v49 = vpop.f32.mrf.mxu1  ;;  %v671_v55 = vmax.f32 %v537_v41, 0.0 }
  0xf9   :  { %v642_v50 = vmax.f32 %v420_v44, 0.0  ;;  %v674_v51 = vmax.f32 %v548_v45, 0.0  ;;  %v412_v52 = vadd.f32 %v1698_v40, %v411_v48  ;;  %v540_v53 = vadd.f32 %v1698_v40, %v539_v49 }
  0xfa   :  { %v1449_v56 = vpop.f32.mrf.mxu0  ;;  %v1481_v57 = vpop.f32.mrf.mxu1 }
  0xfb   :  { %v1216_v58 = vpack.c.bf16 %v642_v50, %v641_v46  ;;  %v1296_v59 = vpack.c.bf16 %v674_v51, %v673_v47  ;;  %v640_v60 = vmax.f32 %v412_v52, 0.0  ;;  %v672_v61 = vmax.f32 %v540_v53, 0.0 }
  0xfc   :  { %v433_v62 = vadd.f32 %v1449_v56, %v1698_v40  ;;  %v561_v63 = vadd.f32 %v1481_v57, %v1698_v40  ;;  %v424_v0 = vpop.f32.mrf.mxu0  ;;  %v552_v1 = vpop.f32.mrf.mxu1 }
  0xfd   :  { %1352 = vst [vmem:[%s1863_s3 + $0x28] sm:$0xff] %v1216_v58   ;;  %1368 = vst [vmem:[%s1863_s3 + $0xa8] sm:$0xff] %v1296_v59   ;;  %v1211_v2 = vpack.c.bf16 %v640_v60, %v639_v54  ;;  %v1291_v3 = vpack.c.bf16 %v672_v61, %v671_v55  ;;  %v425_v4 = vadd.f32 %v1698_v40, %v424_v0 }
  0xfe   :  { %v553_v5 = vadd.f32 %v1698_v40, %v552_v1  ;;  %v1450_v6 = vpop.f32.mrf.mxu0  ;;  %v1482_v7 = vpop.f32.mrf.mxu1  ;;  %v645_v10 = vmax.f32 %v433_v62, 0.0  ;;  %v677_v11 = vmax.f32 %v561_v63, 0.0 }
  0xff   :  { %1351 = vst [vmem:[%s1863_s3 + $0x20] sm:$0xff] %v1211_v2   ;;  %1367 = vst [vmem:[%s1863_s3 + $0xa0] sm:$0xff] %v1291_v3   ;;  %v436_v8 = vadd.f32 %v1450_v6, %v1698_v40  ;;  %v564_v9 = vadd.f32 %v1482_v7, %v1698_v40  ;;  %v643_v18 = vmax.f32 %v425_v4, 0.0 }
 0x100   :  { %v427_v12 = vpop.f32.mrf.mxu0  ;;  %v555_v13 = vpop.f32.mrf.mxu1  ;;  %v675_v19 = vmax.f32 %v553_v5, 0.0 }
 0x101   :  { %v646_v14 = vmax.f32 %v436_v8, 0.0  ;;  %v678_v15 = vmax.f32 %v564_v9, 0.0  ;;  %v428_v16 = vadd.f32 %v1698_v40, %v427_v12  ;;  %v556_v17 = vadd.f32 %v1698_v40, %v555_v13 }
 0x102   :  { %v1453_v20 = vpop.f32.mrf.mxu0  ;;  %v1485_v21 = vpop.f32.mrf.mxu1 }
 0x103   :  { %v1226_v22 = vpack.c.bf16 %v646_v14, %v645_v10  ;;  %v1306_v23 = vpack.c.bf16 %v678_v15, %v677_v11  ;;  %v644_v24 = vmax.f32 %v428_v16, 0.0  ;;  %v676_v25 = vmax.f32 %v556_v17, 0.0 }
 0x104   :  { %v449_v26 = vadd.f32 %v1453_v20, %v1698_v40  ;;  %v577_v27 = vadd.f32 %v1485_v21, %v1698_v40  ;;  %v440_v28 = vpop.f32.mrf.mxu0  ;;  %v568_v29 = vpop.f32.mrf.mxu1 }
 0x105   :  { %1354 = vst [vmem:[%s1863_s3 + $0x38] sm:$0xff] %v1226_v22   ;;  %1370 = vst [vmem:[%s1863_s3 + $0xb8] sm:$0xff] %v1306_v23   ;;  %v1221_v30 = vpack.c.bf16 %v644_v24, %v643_v18  ;;  %v1301_v31 = vpack.c.bf16 %v676_v25, %v675_v19  ;;  %v441_v32 = vadd.f32 %v1698_v40, %v440_v28 }
 0x106   :  { %v569_v33 = vadd.f32 %v1698_v40, %v568_v29  ;;  %v1454_v34 = vpop.f32.mrf.mxu0  ;;  %v1486_v35 = vpop.f32.mrf.mxu1  ;;  %v649_v38 = vmax.f32 %v449_v26, 0.0  ;;  %v681_v39 = vmax.f32 %v577_v27, 0.0 }
 0x107   :  { %1353 = vst [vmem:[%s1863_s3 + $0x30] sm:$0xff] %v1221_v30   ;;  %1369 = vst [vmem:[%s1863_s3 + $0xb0] sm:$0xff] %v1301_v31   ;;  %v452_v36 = vadd.f32 %v1454_v34, %v1698_v40  ;;  %v580_v37 = vadd.f32 %v1486_v35, %v1698_v40  ;;  %v647_v47 = vmax.f32 %v441_v32, 0.0 }
 0x108   :  { %v443_v41 = vpop.f32.mrf.mxu0  ;;  %v571_v42 = vpop.f32.mrf.mxu1  ;;  %v679_v48 = vmax.f32 %v569_v33, 0.0 }
 0x109   :  { %v650_v43 = vmax.f32 %v452_v36, 0.0  ;;  %v682_v44 = vmax.f32 %v580_v37, 0.0  ;;  %v444_v45 = vadd.f32 %v1698_v40, %v443_v41  ;;  %v572_v46 = vadd.f32 %v1698_v40, %v571_v42 }
 0x10a   :  { %v1457_v49 = vpop.f32.mrf.mxu0  ;;  %v1489_v50 = vpop.f32.mrf.mxu1 }
 0x10b   :  { %v1236_v51 = vpack.c.bf16 %v650_v43, %v649_v38  ;;  %v1316_v52 = vpack.c.bf16 %v682_v44, %v681_v39  ;;  %v648_v53 = vmax.f32 %v444_v45, 0.0  ;;  %v680_v54 = vmax.f32 %v572_v46, 0.0 }
 0x10c   :  { %v465_v55 = vadd.f32 %v1457_v49, %v1698_v40  ;;  %v593_v56 = vadd.f32 %v1489_v50, %v1698_v40  ;;  %v456_v57 = vpop.f32.mrf.mxu0  ;;  %v584_v58 = vpop.f32.mrf.mxu1 }
 0x10d   :  { %1356 = vst [vmem:[%s1863_s3 + $0x48] sm:$0xff] %v1236_v51   ;;  %1372 = vst [vmem:[%s1863_s3 + $0xc8] sm:$0xff] %v1316_v52   ;;  %v1231_v59 = vpack.c.bf16 %v648_v53, %v647_v47  ;;  %v1311_v60 = vpack.c.bf16 %v680_v54, %v679_v48  ;;  %v457_v61 = vadd.f32 %v1698_v40, %v456_v57 }
 0x10e   :  { %v585_v62 = vadd.f32 %v1698_v40, %v584_v58  ;;  %v1458_v63 = vpop.f32.mrf.mxu0  ;;  %v1490_v0 = vpop.f32.mrf.mxu1  ;;  %v653_v3 = vmax.f32 %v465_v55, 0.0  ;;  %v685_v4 = vmax.f32 %v593_v56, 0.0 }
 0x10f   :  { %1355 = vst [vmem:[%s1863_s3 + $0x40] sm:$0xff] %v1231_v59   ;;  %1371 = vst [vmem:[%s1863_s3 + $0xc0] sm:$0xff] %v1311_v60   ;;  %v468_v1 = vadd.f32 %v1458_v63, %v1698_v40  ;;  %v596_v2 = vadd.f32 %v1490_v0, %v1698_v40  ;;  %v651_v11 = vmax.f32 %v457_v61, 0.0 }
 0x110   :  { %v459_v5 = vpop.f32.mrf.mxu0  ;;  %v587_v6 = vpop.f32.mrf.mxu1  ;;  %v683_v12 = vmax.f32 %v585_v62, 0.0 }
 0x111   :  { %v654_v7 = vmax.f32 %v468_v1, 0.0  ;;  %v686_v8 = vmax.f32 %v596_v2, 0.0  ;;  %v460_v9 = vadd.f32 %v1698_v40, %v459_v5  ;;  %v588_v10 = vadd.f32 %v1698_v40, %v587_v6 }
 0x112   :  { %v1461_v13 = vpop.f32.mrf.mxu0  ;;  %v1493_v14 = vpop.f32.mrf.mxu1 }
 0x113   :  { %v1246_v15 = vpack.c.bf16 %v654_v7, %v653_v3  ;;  %v1326_v16 = vpack.c.bf16 %v686_v8, %v685_v4  ;;  %v652_v17 = vmax.f32 %v460_v9, 0.0  ;;  %v684_v18 = vmax.f32 %v588_v10, 0.0 }
 0x114   :  { %v481_v19 = vadd.f32 %v1461_v13, %v1698_v40  ;;  %v609_v20 = vadd.f32 %v1493_v14, %v1698_v40  ;;  %v472_v21 = vpop.f32.mrf.mxu0  ;;  %v600_v22 = vpop.f32.mrf.mxu1 }
 0x115   :  { %1358 = vst [vmem:[%s1863_s3 + $0x58] sm:$0xff] %v1246_v15   ;;  %1374 = vst [vmem:[%s1863_s3 + $0xd8] sm:$0xff] %v1326_v16   ;;  %v1241_v23 = vpack.c.bf16 %v652_v17, %v651_v11  ;;  %v1321_v24 = vpack.c.bf16 %v684_v18, %v683_v12  ;;  %v473_v25 = vadd.f32 %v1698_v40, %v472_v21 }
 0x116   :  { %v601_v26 = vadd.f32 %v1698_v40, %v600_v22  ;;  %v1462_v27 = vpop.f32.mrf.mxu0  ;;  %v1494_v28 = vpop.f32.mrf.mxu1  ;;  %v657_v31 = vmax.f32 %v481_v19, 0.0  ;;  %v689_v32 = vmax.f32 %v609_v20, 0.0 }
 0x117   :  { %1357 = vst [vmem:[%s1863_s3 + $0x50] sm:$0xff] %v1241_v23   ;;  %1373 = vst [vmem:[%s1863_s3 + $0xd0] sm:$0xff] %v1321_v24   ;;  %v484_v29 = vadd.f32 %v1462_v27, %v1698_v40  ;;  %v612_v30 = vadd.f32 %v1494_v28, %v1698_v40  ;;  %v655_v39 = vmax.f32 %v473_v25, 0.0 }
 0x118   :  { %v475_v33 = vpop.f32.mrf.mxu0  ;;  %v603_v34 = vpop.f32.mrf.mxu1  ;;  %v687_v41 = vmax.f32 %v601_v26, 0.0 }
 0x119   :  { %v658_v35 = vmax.f32 %v484_v29, 0.0  ;;  %v690_v36 = vmax.f32 %v612_v30, 0.0  ;;  %v476_v37 = vadd.f32 %v1698_v40, %v475_v33  ;;  %v604_v38 = vadd.f32 %v1698_v40, %v603_v34 }
 0x11a   :  { %v1465_v42 = vpop.f32.mrf.mxu0  ;;  %v1497_v43 = vpop.f32.mrf.mxu1 }
 0x11b   :  { %v1256_v44 = vpack.c.bf16 %v658_v35, %v657_v31  ;;  %v1336_v45 = vpack.c.bf16 %v690_v36, %v689_v32  ;;  %v656_v46 = vmax.f32 %v476_v37, 0.0  ;;  %v688_v47 = vmax.f32 %v604_v38, 0.0 }
 0x11c   :  { %v497_v48 = vadd.f32 %v1465_v42, %v1698_v40  ;;  %v625_v49 = vadd.f32 %v1497_v43, %v1698_v40  ;;  %v488_v50 = vpop.f32.mrf.mxu0  ;;  %v616_v51 = vpop.f32.mrf.mxu1 }
 0x11d   :  { %1360 = vst [vmem:[%s1863_s3 + $0x68] sm:$0xff] %v1256_v44   ;;  %1376 = vst [vmem:[%s1863_s3 + $0xe8] sm:$0xff] %v1336_v45   ;;  %v1251_v52 = vpack.c.bf16 %v656_v46, %v655_v39  ;;  %v1331_v53 = vpack.c.bf16 %v688_v47, %v687_v41  ;;  %v489_v54 = vadd.f32 %v1698_v40, %v488_v50 }
 0x11e   :  { %v617_v55 = vadd.f32 %v1698_v40, %v616_v51  ;;  %v1466_v56 = vpop.f32.mrf.mxu0  ;;  %v1498_v57 = vpop.f32.mrf.mxu1  ;;  %v661_v60 = vmax.f32 %v497_v48, 0.0  ;;  %v693_v61 = vmax.f32 %v625_v49, 0.0 }
 0x11f   :  { %1359 = vst [vmem:[%s1863_s3 + $0x60] sm:$0xff] %v1251_v52   ;;  %1375 = vst [vmem:[%s1863_s3 + $0xe0] sm:$0xff] %v1331_v53   ;;  %v500_v58 = vadd.f32 %v1466_v56, %v1698_v40  ;;  %v628_v59 = vadd.f32 %v1498_v57, %v1698_v40  ;;  %v659_v4 = vmax.f32 %v489_v54, 0.0 }
 0x120   :  { %v491_v62 = vpop.f32.mrf.mxu0  ;;  %v619_v63 = vpop.f32.mrf.mxu1  ;;  %v691_v5 = vmax.f32 %v617_v55, 0.0 }
 0x121   :  { %v662_v0 = vmax.f32 %v500_v58, 0.0  ;;  %v694_v1 = vmax.f32 %v628_v59, 0.0  ;;  %v492_v2 = vadd.f32 %v1698_v40, %v491_v62  ;;  %v620_v3 = vadd.f32 %v1698_v40, %v619_v63 }
 0x123   :  { %v1266_v6 = vpack.c.bf16 %v662_v0, %v661_v60  ;;  %v1346_v7 = vpack.c.bf16 %v694_v1, %v693_v61  ;;  %v660_v8 = vmax.f32 %v492_v2, 0.0  ;;  %v692_v9 = vmax.f32 %v620_v3, 0.0 }
 0x125   :  { %1362 = vst [vmem:[%s1863_s3 + $0x78] sm:$0xff] %v1266_v6   ;;  %1378 = vst [vmem:[%s1863_s3 + $0xf8] sm:$0xff] %v1346_v7   ;;  %v1261_v10 = vpack.c.bf16 %v660_v8, %v659_v4  ;;  %v1341_v11 = vpack.c.bf16 %v692_v9, %v691_v5 }
 0x127   :  { %1361 = vst [vmem:[%s1863_s3 + $0x70] sm:$0xff] %v1261_v10   ;;  %1377 = vst [vmem:[%s1863_s3 + $0xf0] sm:$0xff] %v1341_v11  }

// kernel: soft_bottleneck_forward.5
= control target key start
LH: loop header
LB: loop body
LE: loop exit
PB: predicated region body
PF: predicated region fallthrough
CT: control target
= control target key end

     0   :  { %v777_v0 = vmov 0.0   ;;  %vm778_vm0 = vmmov 0   ;;  %s1040_s3 = inlined_call_operand.vmem [shape: bf16[128,128], index: 3, kind: input, shape index: {}]   ;;  %s1041_s1 = inlined_call_operand.vmem [shape: bf16[128,128], index: 1, kind: input, shape index: {}]   ;;  %s1042_s2 = inlined_call_operand.vmem [shape: bf16[144,128], index: 2, kind: input, shape index: {}]   ;;  %s1043_s0 = inlined_call_operand.vmem [shape: bf16[144,128], index: 0, kind: input, shape index: {}]   ;;  %s1044_s4 = inlined_call_operand.vmem [shape: f32[1,128], index: 4, kind: input, shape index: {}]   ;;  %s1045_s5 = inlined_call_operand.vmem [shape: f32[144,128], index: 5, kind: output, shape index: {}]  }
   0x1   :  { %637 = vmatprep.subr.bf16.mxu0 %v777_v0  ;;  %689 = vmatprep.subr.bf16.mxu1 %v777_v0  ;;  %v743_v1 = vld [vmem:[%s1040_s3 + $0x38] sm:$0xff]   ;;  %v745_v3 = vld [vmem:[%s1040_s3 + $0x30] sm:$0xff]   ;;  %v747_v5 = vld [vmem:[%s1040_s3 + $0x28] sm:$0xff]  }
   0x2   :  { %v744_v2 = vld [vmem:[%s1041_s1 + $0x38] sm:$0xff]   ;;  %653 = vmatprep.mubr.msk.bf16.mxu0 %vm778_vm0, %v777_v0  ;;  %705 = vmatprep.mubr.msk.bf16.mxu1 %vm778_vm0, %v777_v0  ;;  %v746_v4 = vld [vmem:[%s1041_s1 + $0x30] sm:$0xff]   ;;  %v748_v6 = vld [vmem:[%s1041_s1 + $0x28] sm:$0xff]  }
   0x3   :  { %638 = vmatpush3.bf16.msra.mxu0 %v743_v1  ;;  %690 = vmatpush3.bf16.msra.mxu1 %v744_v2  ;;  %v749_v7 = vld [vmem:[%s1040_s3 + $0x20] sm:$0xff]   ;;  %v751_v9 = vld [vmem:[%s1040_s3 + $0x18] sm:$0xff]   ;;  %v753_v11 = vld [vmem:[%s1040_s3 + $0x10] sm:$0xff]  }
   0x4   :  { %639 = vmatprep.subr.bf16.mxu0 %v777_v0  ;;  %691 = vmatprep.subr.bf16.mxu1 %v777_v0  ;;  %v750_v8 = vld [vmem:[%s1041_s1 + $0x20] sm:$0xff]   ;;  %v752_v10 = vld [vmem:[%s1041_s1 + $0x18] sm:$0xff]   ;;  %v754_v12 = vld [vmem:[%s1041_s1 + $0x10] sm:$0xff]  }
   0x5   :  { %v755_v13 = vld [vmem:[%s1040_s3 + $0x8] sm:$0xff]   ;;  %v757_v15 = vld [vmem:[%s1040_s3] sm:$0xff]   ;;  %v763_v21 = vld [vmem:[%s1042_s2 + $0x10] sm:$0xff]  }
   0x6   :  { %v756_v14 = vld [vmem:[%s1041_s1 + $0x8] sm:$0xff]   ;;  %v758_v16 = vld [vmem:[%s1041_s1] sm:$0xff]   ;;  %v764_v22 = vld [vmem:[%s1043_s0 + $0x10] sm:$0xff]  }
   0x7   :  { %640 = vmatpush3.bf16.msra.mxu0 %v745_v3  ;;  %692 = vmatpush3.bf16.msra.mxu1 %v746_v4  ;;  %v759_v17 = vld [vmem:[%s1042_s2] sm:$0xff]   ;;  %v761_v19 = vld [vmem:[%s1042_s2 + $0x8] sm:$0xff]   ;;  %v765_v23 = vld [vmem:[%s1042_s2 + $0x18] sm:$0xff]  }
   0x8   :  { %641 = vmatprep.subr.bf16.mxu0 %v777_v0  ;;  %693 = vmatprep.subr.bf16.mxu1 %v777_v0  ;;  %v760_v18 = vld [vmem:[%s1043_s0] sm:$0xff]   ;;  %v762_v20 = vld [vmem:[%s1043_s0 + $0x8] sm:$0xff]   ;;  %v766_v24 = vld [vmem:[%s1043_s0 + $0x18] sm:$0xff]  }
   0x9   :  { %v767_v25 = vld [vmem:[%s1042_s2 + $0x20] sm:$0xff]   ;;  %v769_v27 = vld [vmem:[%s1042_s2 + $0x28] sm:$0xff]   ;;  %v771_v29 = vld [vmem:[%s1042_s2 + $0x30] sm:$0xff]  }
   0xa   :  { %v768_v26 = vld [vmem:[%s1043_s0 + $0x20] sm:$0xff]   ;;  %v770_v28 = vld [vmem:[%s1043_s0 + $0x28] sm:$0xff]   ;;  %v772_v30 = vld [vmem:[%s1043_s0 + $0x30] sm:$0xff]  }
   0xb   :  { %642 = vmatpush3.bf16.msra.mxu0 %v747_v5  ;;  %694 = vmatpush3.bf16.msra.mxu1 %v748_v6  ;;  %v773_v31 = vld [vmem:[%s1042_s2 + $0x38] sm:$0xff]   ;;  %v775_v33 = vld [vmem:[%s1042_s2 + $0x40] sm:$0xff]  }
   0xc   :  { %643 = vmatprep.subr.bf16.mxu0 %v777_v0  ;;  %695 = vmatprep.subr.bf16.mxu1 %v777_v0  ;;  %v774_v32 = vld [vmem:[%s1043_s0 + $0x38] sm:$0xff]   ;;  %v776_v34 = vld [vmem:[%s1043_s0 + $0x40] sm:$0xff]  }
   0xd   :  { %v966_v37 = vld [vmem:[%s1044_s4] ss:$0 sm:$0xff] }
   0xf   :  { %644 = vmatpush3.bf16.msra.mxu0 %v749_v7  ;;  %696 = vmatpush3.bf16.msra.mxu1 %v750_v8 }
  0x10   :  { %645 = vmatprep.subr.bf16.mxu0 %v777_v0  ;;  %697 = vmatprep.subr.bf16.mxu1 %v777_v0 }
  0x13   :  { %646 = vmatpush3.bf16.msra.mxu0 %v751_v9  ;;  %698 = vmatpush3.bf16.msra.mxu1 %v752_v10 }
  0x14   :  { %647 = vmatprep.subr.bf16.mxu0 %v777_v0  ;;  %699 = vmatprep.subr.bf16.mxu1 %v777_v0 }
  0x17   :  { %648 = vmatpush3.bf16.msra.mxu0 %v753_v11  ;;  %700 = vmatpush3.bf16.msra.mxu1 %v754_v12 }
  0x18   :  { %649 = vmatprep.subr.bf16.mxu0 %v777_v0  ;;  %701 = vmatprep.subr.bf16.mxu1 %v777_v0 }
  0x1b   :  { %650 = vmatpush3.bf16.msra.mxu0 %v755_v13  ;;  %702 = vmatpush3.bf16.msra.mxu1 %v756_v14 }
  0x1c   :  { %651 = vmatprep.subr.bf16.mxu0 %v777_v0  ;;  %703 = vmatprep.subr.bf16.mxu1 %v777_v0 }
  0x1f   :  { %652 = vmatpush3.bf16.msra.mxu0 %v757_v15  ;;  %704 = vmatpush3.bf16.msra.mxu1 %v758_v16 }
  0x22   :  { %654 = vmatmul.mubr.bf16.vlgmr.msra.gmra.mxu0 %v759_v17  ;;  %706 = vmatmul.mubr.bf16.vlgmr.msra.gmra.mxu1 %v760_v18 }
  0x23   :  { %657 = vmatprep.mubr.msk.bf16.mxu0 %vm778_vm0, %v777_v0  ;;  %709 = vmatprep.mubr.msk.bf16.mxu1 %vm778_vm0, %v777_v0 }
  0x2a   :  { %658 = vmatmul.mubr.bf16.gmra.mxu0 %v761_v19  ;;  %710 = vmatmul.mubr.bf16.gmra.mxu1 %v762_v20 }
  0x2b   :  { %661 = vmatprep.mubr.msk.bf16.mxu0 %vm778_vm0, %v777_v0  ;;  %713 = vmatprep.mubr.msk.bf16.mxu1 %vm778_vm0, %v777_v0 }
  0x32   :  { %662 = vmatmul.mubr.bf16.gmra.mxu0 %v763_v21  ;;  %714 = vmatmul.mubr.bf16.gmra.mxu1 %v764_v22 }
  0x33   :  { %665 = vmatprep.mubr.msk.bf16.mxu0 %vm778_vm0, %v777_v0  ;;  %717 = vmatprep.mubr.msk.bf16.mxu1 %vm778_vm0, %v777_v0 }
  0x3a   :  { %666 = vmatmul.mubr.bf16.gmra.mxu0 %v765_v23  ;;  %718 = vmatmul.mubr.bf16.gmra.mxu1 %v766_v24 }
  0x3b   :  { %669 = vmatprep.mubr.msk.bf16.mxu0 %vm778_vm0, %v777_v0  ;;  %721 = vmatprep.mubr.msk.bf16.mxu1 %vm778_vm0, %v777_v0 }
  0x42   :  { %670 = vmatmul.mubr.bf16.gmra.mxu0 %v767_v25  ;;  %722 = vmatmul.mubr.bf16.gmra.mxu1 %v768_v26 }
  0x43   :  { %673 = vmatprep.mubr.msk.bf16.mxu0 %vm778_vm0, %v777_v0  ;;  %725 = vmatprep.mubr.msk.bf16.mxu1 %vm778_vm0, %v777_v0 }
  0x4a   :  { %674 = vmatmul.mubr.bf16.gmra.mxu0 %v769_v27  ;;  %726 = vmatmul.mubr.bf16.gmra.mxu1 %v770_v28 }
  0x4b   :  { %677 = vmatprep.mubr.msk.bf16.mxu0 %vm778_vm0, %v777_v0  ;;  %729 = vmatprep.mubr.msk.bf16.mxu1 %vm778_vm0, %v777_v0 }
  0x52   :  { %678 = vmatmul.mubr.bf16.gmra.mxu0 %v771_v29  ;;  %730 = vmatmul.mubr.bf16.gmra.mxu1 %v772_v30 }
  0x53   :  { %681 = vmatprep.mubr.msk.bf16.mxu0 %vm778_vm0, %v777_v0  ;;  %733 = vmatprep.mubr.msk.bf16.mxu1 %vm778_vm0, %v777_v0 }
  0x5a   :  { %682 = vmatmul.mubr.bf16.gmra.mxu0 %v773_v31  ;;  %734 = vmatmul.mubr.bf16.gmra.mxu1 %v774_v32 }
  0x5b   :  { %685 = vmatprep.mubr.msk.bf16.mxu0 %vm778_vm0, %v777_v0  ;;  %737 = vmatprep.mubr.msk.bf16.mxu1 %vm778_vm0, %v777_v0 }
  0x62   :  { %686 = vmatmul.mubr.bf16.gmra.mxu0 %v775_v33  ;;  %738 = vmatmul.mubr.bf16.gmra.mxu1 %v776_v34 }
  0xe2   :  { %v225_v35 = vpop.f32.mrf.mxu0  ;;  %v432_v36 = vpop.f32.mrf.mxu1 }
  0xe3   :  { %v433_v38 = vadd.f32 %v432_v36, %v225_v35 }
  0xe4   :  { %v655_v39 = vpop.f32.mrf.mxu0  ;;  %v707_v40 = vpop.f32.mrf.mxu1 }
  0xe5   :  { %v510_v41 = vadd.f32 %v966_v37, %v433_v38 }
  0xe6   :  { %v228_v42 = vpop.f32.mrf.mxu0  ;;  %v435_v43 = vpop.f32.mrf.mxu1 }
  0xe7   :  { %v528_v44 = vmax.f32 %v510_v41, 0.0  ;;  %v436_v45 = vadd.f32 %v435_v43, %v228_v42 }
  0xe8   :  { %v656_v46 = vpop.f32.mrf.mxu0  ;;  %v708_v47 = vpop.f32.mrf.mxu1 }
  0xe9   :  { %546 = vst [vmem:[%s1045_s5] sm:$0xff] %v528_v44  ;;  %v511_v48 = vadd.f32 %v966_v37, %v436_v45 }
  0xea   :  { %v233_v49 = vpop.f32.mrf.mxu0  ;;  %v440_v50 = vpop.f32.mrf.mxu1 }
  0xeb   :  { %v529_v51 = vmax.f32 %v511_v48, 0.0  ;;  %v441_v52 = vadd.f32 %v440_v50, %v233_v49 }
  0xec   :  { %v659_v53 = vpop.f32.mrf.mxu0  ;;  %v711_v54 = vpop.f32.mrf.mxu1 }
  0xed   :  { %547 = vst [vmem:[%s1045_s5 + $0x8] sm:$0xff] %v529_v51  ;;  %v512_v55 = vadd.f32 %v966_v37, %v441_v52 }
  0xee   :  { %v236_v56 = vpop.f32.mrf.mxu0  ;;  %v443_v57 = vpop.f32.mrf.mxu1 }
  0xef   :  { %v530_v58 = vmax.f32 %v512_v55, 0.0  ;;  %v444_v59 = vadd.f32 %v443_v57, %v236_v56 }
  0xf0   :  { %v660_v60 = vpop.f32.mrf.mxu0  ;;  %v712_v61 = vpop.f32.mrf.mxu1 }
  0xf1   :  { %548 = vst [vmem:[%s1045_s5 + $0x10] sm:$0xff] %v530_v58  ;;  %v513_v62 = vadd.f32 %v966_v37, %v444_v59 }
  0xf2   :  { %v241_v63 = vpop.f32.mrf.mxu0  ;;  %v448_v0 = vpop.f32.mrf.mxu1 }
  0xf3   :  { %v531_v1 = vmax.f32 %v513_v62, 0.0  ;;  %v449_v2 = vadd.f32 %v448_v0, %v241_v63 }
  0xf4   :  { %v663_v3 = vpop.f32.mrf.mxu0  ;;  %v715_v4 = vpop.f32.mrf.mxu1 }
  0xf5   :  { %549 = vst [vmem:[%s1045_s5 + $0x18] sm:$0xff] %v531_v1  ;;  %v514_v5 = vadd.f32 %v966_v37, %v449_v2 }
  0xf6   :  { %v244_v6 = vpop.f32.mrf.mxu0  ;;  %v451_v7 = vpop.f32.mrf.mxu1 }
  0xf7   :  { %v532_v8 = vmax.f32 %v514_v5, 0.0  ;;  %v452_v9 = vadd.f32 %v451_v7, %v244_v6 }
  0xf8   :  { %v664_v10 = vpop.f32.mrf.mxu0  ;;  %v716_v11 = vpop.f32.mrf.mxu1 }
  0xf9   :  { %550 = vst [vmem:[%s1045_s5 + $0x20] sm:$0xff] %v532_v8  ;;  %v515_v12 = vadd.f32 %v966_v37, %v452_v9 }
  0xfa   :  { %v249_v13 = vpop.f32.mrf.mxu0  ;;  %v456_v14 = vpop.f32.mrf.mxu1 }
  0xfb   :  { %v533_v15 = vmax.f32 %v515_v12, 0.0  ;;  %v457_v16 = vadd.f32 %v456_v14, %v249_v13 }
  0xfc   :  { %v667_v17 = vpop.f32.mrf.mxu0  ;;  %v719_v18 = vpop.f32.mrf.mxu1 }
  0xfd   :  { %551 = vst [vmem:[%s1045_s5 + $0x28] sm:$0xff] %v533_v15  ;;  %v516_v19 = vadd.f32 %v966_v37, %v457_v16 }
  0xfe   :  { %v252_v20 = vpop.f32.mrf.mxu0  ;;  %v459_v21 = vpop.f32.mrf.mxu1 }
  0xff   :  { %v534_v22 = vmax.f32 %v516_v19, 0.0  ;;  %v460_v23 = vadd.f32 %v459_v21, %v252_v20 }
 0x100   :  { %v668_v24 = vpop.f32.mrf.mxu0  ;;  %v720_v25 = vpop.f32.mrf.mxu1 }
 0x101   :  { %552 = vst [vmem:[%s1045_s5 + $0x30] sm:$0xff] %v534_v22  ;;  %v517_v26 = vadd.f32 %v966_v37, %v460_v23 }
 0x102   :  { %v257_v27 = vpop.f32.mrf.mxu0  ;;  %v464_v28 = vpop.f32.mrf.mxu1 }
 0x103   :  { %v535_v29 = vmax.f32 %v517_v26, 0.0  ;;  %v465_v30 = vadd.f32 %v464_v28, %v257_v27 }
 0x104   :  { %v671_v31 = vpop.f32.mrf.mxu0  ;;  %v723_v32 = vpop.f32.mrf.mxu1 }
 0x105   :  { %553 = vst [vmem:[%s1045_s5 + $0x38] sm:$0xff] %v535_v29  ;;  %v518_v33 = vadd.f32 %v966_v37, %v465_v30 }
 0x106   :  { %v260_v34 = vpop.f32.mrf.mxu0  ;;  %v467_v35 = vpop.f32.mrf.mxu1 }
 0x107   :  { %v536_v36 = vmax.f32 %v518_v33, 0.0  ;;  %v468_v38 = vadd.f32 %v467_v35, %v260_v34 }
 0x108   :  { %v672_v39 = vpop.f32.mrf.mxu0  ;;  %v724_v40 = vpop.f32.mrf.mxu1 }
 0x109   :  { %554 = vst [vmem:[%s1045_s5 + $0x40] sm:$0xff] %v536_v36  ;;  %v519_v41 = vadd.f32 %v966_v37, %v468_v38 }
 0x10a   :  { %v265_v42 = vpop.f32.mrf.mxu0  ;;  %v472_v43 = vpop.f32.mrf.mxu1 }
 0x10b   :  { %v537_v44 = vmax.f32 %v519_v41, 0.0  ;;  %v473_v45 = vadd.f32 %v472_v43, %v265_v42 }
 0x10c   :  { %v675_v46 = vpop.f32.mrf.mxu0  ;;  %v727_v47 = vpop.f32.mrf.mxu1 }
 0x10d   :  { %555 = vst [vmem:[%s1045_s5 + $0x48] sm:$0xff] %v537_v44  ;;  %v520_v48 = vadd.f32 %v966_v37, %v473_v45 }
 0x10e   :  { %v268_v49 = vpop.f32.mrf.mxu0  ;;  %v475_v50 = vpop.f32.mrf.mxu1 }
 0x10f   :  { %v538_v51 = vmax.f32 %v520_v48, 0.0  ;;  %v476_v52 = vadd.f32 %v475_v50, %v268_v49 }
 0x110   :  { %v676_v53 = vpop.f32.mrf.mxu0  ;;  %v728_v54 = vpop.f32.mrf.mxu1 }
 0x111   :  { %556 = vst [vmem:[%s1045_s5 + $0x50] sm:$0xff] %v538_v51  ;;  %v521_v55 = vadd.f32 %v966_v37, %v476_v52 }
 0x112   :  { %v273_v56 = vpop.f32.mrf.mxu0  ;;  %v480_v57 = vpop.f32.mrf.mxu1 }
 0x113   :  { %v539_v58 = vmax.f32 %v521_v55, 0.0  ;;  %v481_v59 = vadd.f32 %v480_v57, %v273_v56 }
 0x114   :  { %v679_v60 = vpop.f32.mrf.mxu0  ;;  %v731_v61 = vpop.f32.mrf.mxu1 }
 0x115   :  { %557 = vst [vmem:[%s1045_s5 + $0x58] sm:$0xff] %v539_v58  ;;  %v522_v62 = vadd.f32 %v966_v37, %v481_v59 }
 0x116   :  { %v276_v63 = vpop.f32.mrf.mxu0  ;;  %v483_v0 = vpop.f32.mrf.mxu1 }
 0x117   :  { %v540_v1 = vmax.f32 %v522_v62, 0.0  ;;  %v484_v2 = vadd.f32 %v483_v0, %v276_v63 }
 0x118   :  { %v680_v3 = vpop.f32.mrf.mxu0  ;;  %v732_v4 = vpop.f32.mrf.mxu1 }
 0x119   :  { %558 = vst [vmem:[%s1045_s5 + $0x60] sm:$0xff] %v540_v1  ;;  %v523_v5 = vadd.f32 %v966_v37, %v484_v2 }
 0x11a   :  { %v281_v6 = vpop.f32.mrf.mxu0  ;;  %v488_v7 = vpop.f32.mrf.mxu1 }
 0x11b   :  { %v541_v8 = vmax.f32 %v523_v5, 0.0  ;;  %v489_v9 = vadd.f32 %v488_v7, %v281_v6 }
 0x11c   :  { %v683_v10 = vpop.f32.mrf.mxu0  ;;  %v735_v11 = vpop.f32.mrf.mxu1 }
 0x11d   :  { %559 = vst [vmem:[%s1045_s5 + $0x68] sm:$0xff] %v541_v8  ;;  %v524_v12 = vadd.f32 %v966_v37, %v489_v9 }
 0x11e   :  { %v284_v13 = vpop.f32.mrf.mxu0  ;;  %v491_v14 = vpop.f32.mrf.mxu1 }
 0x11f   :  { %v542_v15 = vmax.f32 %v524_v12, 0.0  ;;  %v492_v16 = vadd.f32 %v491_v14, %v284_v13 }
 0x120   :  { %v684_v17 = vpop.f32.mrf.mxu0  ;;  %v736_v18 = vpop.f32.mrf.mxu1 }
 0x121   :  { %560 = vst [vmem:[%s1045_s5 + $0x70] sm:$0xff] %v542_v15  ;;  %v525_v19 = vadd.f32 %v966_v37, %v492_v16 }
 0x122   :  { %v289_v20 = vpop.f32.mrf.mxu0  ;;  %v496_v21 = vpop.f32.mrf.mxu1 }
 0x123   :  { %v543_v22 = vmax.f32 %v525_v19, 0.0  ;;  %v497_v23 = vadd.f32 %v496_v21, %v289_v20 }
 0x124   :  { %v687_v24 = vpop.f32.mrf.mxu0  ;;  %v739_v25 = vpop.f32.mrf.mxu1 }
 0x125   :  { %561 = vst [vmem:[%s1045_s5 + $0x78] sm:$0xff] %v543_v22  ;;  %v526_v26 = vadd.f32 %v966_v37, %v497_v23 }
 0x126   :  { %v292_v27 = vpop.f32.mrf.mxu0  ;;  %v499_v28 = vpop.f32.mrf.mxu1 }
 0x127   :  { %v544_v29 = vmax.f32 %v526_v26, 0.0  ;;  %v500_v30 = vadd.f32 %v499_v28, %v292_v27 }
 0x128   :  { %v688_v31 = vpop.f32.mrf.mxu0  ;;  %v740_v32 = vpop.f32.mrf.mxu1 }
 0x129   :  { %562 = vst [vmem:[%s1045_s5 + $0x80] sm:$0xff] %v544_v29  ;;  %v527_v33 = vadd.f32 %v966_v37, %v500_v30 }
 0x12b   :  { %v545_v34 = vmax.f32 %v527_v33, 0.0 }
 0x12d   :  { %563 = vst [vmem:[%s1045_s5 + $0x88] sm:$0xff] %v545_v34 }

// kernel: soft_bottleneck_forward.4
= control target key start
LH: loop header
LB: loop body
LE: loop exit
PB: predicated region body
PF: predicated region fallthrough
CT: control target
= control target key end

     0   :  { %s3166_s12 = smov 0   ;;  %s3168_s13 = smov 0   ;;  %s3740_s0 = inlined_call_operand.vmem [shape: bf16[2,2,2,90,128], index: 0, kind: input, shape index: {}]   ;;  %s3741_s1 = inlined_call_operand.vmem [shape: bf16[9,128,128], index: 1, kind: input, shape index: {}]   ;;  %s3742_s2 = inlined_call_operand.vmem [shape: f32[1,128], index: 2, kind: input, shape index: {}]   ;;  %s3743_s3 = inlined_call_operand.vmem [shape: bf16[2,72,128], index: 3, kind: output, shape index: {}]  }
   0x1   :  { %s3170_s14 = smov 0  }
   0x2 LB: > { %s25_s15 = sadd.s32 1, %s3138_s13  ;;  %p2187_p0 = scmp.ge.s32.totalorder %s3142_s14, 1  ;;  %s3142_s14 = sphi %s3170_s14, %s13_s14   ;;  %s3138_s13 = sphi %s3168_s13, %s3745_s13   ;;  %s3134_s12 = sphi %s3166_s12, %s3744_s12  }
   0x3   : > { %p27_p1 = scmp.ge.s32.totalorder %s25_s15, 2  ;;  %p168_p2 = scmp.lt.s32.totalorder %s3142_s14, 3 }
   0x5   : > { %s3747_s15 = smov (%p27_p1, %s25_s15), 0  ;;  %p169_p3 = pnand %p2187_p0, %p168_p2 }
   0x6   : > { %p202_p4 = scmp.lt.s32.totalorder (!%p169_p3), %s3134_s12, 1 }
   0x7   : > { %172 = sbr.rel (%p169_p3) target bundleno = 427 (0x1ab), region = 32 }
   0xc   : > { %v3007_v0 = vld [vmem:[%s3741_s1 + $0x78] sm:$0xff]   ;;  %v3144_v1 = vmov 0.0   ;;  %v3009_v3 = vld [vmem:[%s3741_s1 + $0x70] sm:$0xff]   ;;  %vm3145_vm0 = vmmov 0   ;;  %v3011_v5 = vld [vmem:[%s3741_s1 + $0x68] sm:$0xff]   ;;  %s3749_s12 = smov (!%p202_p4, %s3134_s12), 1 }
   0xd   : > { %2639 = vmatprep.subr.bf16.mxu0 %v3144_v1  ;;  %2675 = vmatprep.subr.bf16.mxu1 %v3144_v1  ;;  %v3008_v2 = vld [vmem:[%s3741_s1 + $0x38] sm:$0xff]   ;;  %v3010_v4 = vld [vmem:[%s3741_s1 + $0x30] sm:$0xff]   ;;  %v3012_v6 = vld [vmem:[%s3741_s1 + $0x28] sm:$0xff]   ;;  %s2979_s5 = smul.u32 192, %s3749_s12  ;;  %vm623_vm1 = vsmask.f32 7424 }
   0xe   : > { %2640 = vmatpush3.bf16.msra.mxu0 %v3007_v0  ;;  %2655 = vmatprep.mubr.msk.bf16.mxu0 %vm3145_vm0, %v3144_v1  ;;  %v3013_v7 = vld [vmem:[%s3741_s1 + $0x60] sm:$0xff]   ;;  %v3015_v9 = vld [vmem:[%s3741_s1 + $0x58] sm:$0xff]   ;;  %v3017_v11 = vld [vmem:[%s3741_s1 + $0x50] sm:$0xff]   ;;  %vm1861_vm2 = vcmask 1046528  }
   0xf   : > { %2676 = vmatpush3.bf16.msra.mxu1 %v3008_v2  ;;  %2641 = vmatprep.subr.bf16.mxu0 %v3144_v1  ;;  %v3014_v8 = vld [vmem:[%s3741_s1 + $0x20] sm:$0xff]   ;;  %v3016_v10 = vld [vmem:[%s3741_s1 + $0x18] sm:$0xff]   ;;  %s3237_s16 = scalar_lea.vmem %s3740_s0, %s2979_s5  ;;  %v3018_v12 = vld [vmem:[%s3741_s1 + $0x10] sm:$0xff]   ;;  %s2980_s5 = smul.u32 36, %s3749_s12 }
  0x10   : > { %2677 = vmatprep.subr.bf16.mxu1 %v3144_v1  ;;  %2691 = vmatprep.mubr.msk.bf16.mxu1 %vm3145_vm0, %v3144_v1  ;;  %v3019_v13 = vld [vmem:[%s3741_s1 + $0x48] sm:$0xff]   ;;  %v3021_v15 = vld [vmem:[%s3741_s1 + $0x40] sm:$0xff]   ;;  %v3023_v17 = vld [vmem:[%s3237_s16 + $0x30] sm:$0xff]  }
  0x11   : > { %v3020_v14 = vld [vmem:[%s3741_s1 + $0x8] sm:$0xff]   ;;  %v3022_v16 = vld [vmem:[%s3741_s1] sm:$0xff]   ;;  %v3025_v19 = vld [vmem:[%s3741_s1 + $0xb8] sm:$0xff]   ;;  %s3712_s12 = scalar_lea.vmem %s3743_s3, %s2980_s5 }
  0x12   : > { %2642 = vmatpush3.bf16.msra.mxu0 %v3009_v3  ;;  %v3024_v18 = vld [vmem:[%s3237_s16] sm:$0xff]   ;;  %v3029_v20 = vld [vmem:[%s3741_s1 + $0xf8] sm:$0xff]   ;;  %v3026_v21 = vld [vmem:[%s3741_s1 + $0xb0] sm:$0xff]  }
  0x13   : > { %2678 = vmatpush3.bf16.msra.mxu1 %v3010_v4  ;;  %2643 = vmatprep.subr.bf16.mxu0 %v3144_v1  ;;  %v3027_v22 = vld [vmem:[%s3237_s16 + $0x38] sm:$0xff]   ;;  %v3031_v23 = vld [vmem:[%s3741_s1 + $0xf0] sm:$0xff]   ;;  %v3028_v24 = vld [vmem:[%s3237_s16 + $0x8] sm:$0xff]  }
  0x14   : > { %2679 = vmatprep.subr.bf16.mxu1 %v3144_v1  ;;  %v3030_v25 = vld [vmem:[%s3741_s1 + $0xa8] sm:$0xff]   ;;  %v3034_v27 = vld [vmem:[%s3741_s1 + $0xa0] sm:$0xff]   ;;  %v3033_v30 = vld [vmem:[%s3237_s16 + $0x10] sm:$0xff]  }
  0x15   : > { %v3035_v26 = vld [vmem:[%s3741_s1 + $0xe8] sm:$0xff]   ;;  %v3032_v28 = vld [vmem:[%s3237_s16 + $0x40] sm:$0xff]   ;;  %v3036_v31 = vld [vmem:[%s3741_s1 + $0x98] sm:$0xff]  }
  0x16   : > { %2644 = vmatpush3.bf16.msra.mxu0 %v3011_v5  ;;  %v3037_v29 = vld [vmem:[%s3741_s1 + $0xe0] sm:$0xff]   ;;  %v3040_v32 = vld [vmem:[%s3741_s1 + $0xd8] sm:$0xff]   ;;  %v3041_v33 = vld [vmem:[%s3741_s1 + $0x90] sm:$0xff]  }
  0x17   : > { %2680 = vmatpush3.bf16.msra.mxu1 %v3012_v6  ;;  %2645 = vmatprep.subr.bf16.mxu0 %v3144_v1  ;;  %v3038_v34 = vld [vmem:[%s3237_s16 + $0x48] sm:$0xff]   ;;  %v3042_v35 = vld [vmem:[%s3741_s1 + $0xd0] sm:$0xff]   ;;  %v3039_v36 = vld [vmem:[%s3237_s16 + $0x18] sm:$0xff]  }
  0x18   : > { %2681 = vmatprep.subr.bf16.mxu1 %v3144_v1  ;;  %v3049_v37 = vld [vmem:[%s3237_s16] sm:$0xff]   ;;  %v3043_v38 = vld [vmem:[%s3741_s1 + $0x88] sm:$0xff]   ;;  %v3044_v42 = vld [vmem:[%s3237_s16 + $0x50] ss:$0 sps:$4 sm:$0xff]  }
  0x19   : > { %v3046_v39 = vld [vmem:[%s3741_s1 + $0xc8] sm:$0xff]   ;;  %v627_v41 = vshll.u32 %v3049_v37, 16  ;;  %v3047_v43 = vld [vmem:[%s3741_s1 + $0x80] sm:$0xff]   ;;  %v625_v46 = vshrl.u32 %v3049_v37, 16  ;;  %v3054_v51 = vld [vmem:[%s3237_s16 + $0x10] sm:$0xff]  }
  0x1a   : > { %2646 = vmatpush3.bf16.msra.mxu0 %v3013_v7  ;;  %v3050_v40 = vld [vmem:[%s3237_s16 + $0x8] sm:$0xff]   ;;  %v3045_v44 = vld [vmem:[%s3237_s16 + $0x20] ss:$0 sps:$4 sm:$0xff]   ;;  %v3052_v53 = vld [vmem:[%s3741_s1 + $0x138] sm:$0xff]   ;;  %v640_v56 = vshll.u32 %v3054_v51, 16  ;;  %v644_v4 = vshrl.u32 %v3054_v51, 16 }
  0x1b   : > { %2682 = vmatpush3.bf16.msra.mxu1 %v3014_v8  ;;  %2647 = vmatprep.subr.bf16.mxu0 %v3144_v1  ;;  %v3048_v45 = vld [vmem:[%s3741_s1 + $0xc0] sm:$0xff]   ;;  %v629_v47 = vrot.slane %v627_v41, 1  ;;  %v632_v48 = vshll.u32 %v3050_v40, 16  ;;  %v636_v55 = vshrl.u32 %v3050_v40, 16  ;;  %v3056_v57 = vld [vmem:[%s3741_s1 + $0x178] sm:$0xff]   ;;  %v3053_v59 = vld [vmem:[%s3741_s1 + $0x130] sm:$0xff]  }
  0x1c   : > { %2683 = vmatprep.subr.bf16.mxu1 %v3144_v1  ;;  %v3051_v52 = vld [vmem:[%s3237_s16 + $0x60] sm:$0xff]   ;;  %v3059_v58 = vld [vmem:[%s3237_s16 + $0x18] sm:$0xff]   ;;  %v642_v61 = vrot.slane %v640_v56, 1  ;;  %v3058_v62 = vld [vmem:[%s3741_s1 + $0x170] sm:$0xff]  }
  0x1d   : > { %v630_v49 = vor.u32 %v629_v47, %v625_v46  ;;  %v634_v50 = vrot.slane %v632_v48, 1  ;;  %v3055_v63 = vld [vmem:[%s3237_s16 + $0x68] sm:$0xff]   ;;  %v648_v0 = vshll.u32 %v3059_v58, 16  ;;  %v3061_v7 = vld [vmem:[%s3741_s1 + $0x120] sm:$0xff]   ;;  %v3078_v40 = vld [vmem:[%s3741_s1 + $0x1b8] sm:$0xff]  }
  0x1e   : > { %2648 = vmatpush3.bf16.msra.mxu0 %v3015_v9  ;;  %v3057_v3 = vld [vmem:[%s3741_s1 + $0x128] sm:$0xff]   ;;  %v646_v8 = vor.u32 %v644_v4, %v642_v61  ;;  %v3065_v9 = vld [vmem:[%s3237_s16 + $0x20] sm:$0x1f]   ;;  %v3086_v48 = vld [vmem:[%s3237_s16 + $0x78] sm:$0xff]  }
  0x1f   : > { %2684 = vmatpush3.bf16.msra.mxu1 %v3016_v10  ;;  %2649 = vmatprep.subr.bf16.mxu0 %v3144_v1  ;;  %v635_v54 = vsel %vm623_vm1, %v630_v49, %v634_v50  ;;  %v638_v60 = vor.u32 %v636_v55, %v634_v50  ;;  %v3062_v5 = vld [vmem:[%s3741_s1 + $0x168] sm:$0xff]   ;;  %v650_v6 = vrot.slane %v648_v0, 1  ;;  %v3064_v10 = vld [vmem:[%s3741_s1 + $0x160] sm:$0xff]   ;;  %v3084_v49 = vld [vmem:[%s3741_s1 + $0x1f0] sm:$0xff]   ;;  %v1245_v0 = vshrl.u32 %v3086_v48, 16 }
  0x20   : > { %2685 = vmatprep.subr.bf16.mxu1 %v3144_v1  ;;  %v3080_v50 = vld [vmem:[%s3237_s16 + $0x98] sm:$0xff]   ;;  %v3083_v51 = vld [vmem:[%s3741_s1 + $0x1a8] sm:$0xff]   ;;  %v3087_v56 = vld [vmem:[%s3741_s1 + $0x1a0] sm:$0xff]  }
  0x21   : > { %v643_v2 = vsel %vm623_vm1, %v638_v60, %v642_v61  ;;  %v3088_v55 = vld [vmem:[%s3741_s1 + $0x1e8] sm:$0xff]   ;;  %v3090_v60 = vld [vmem:[%s3741_s1 + $0x1e0] sm:$0xff]   ;;  %v3094_v4 = vld [vmem:[%s3741_s1 + $0x190] sm:$0xff]  }
  0x22   : > { %2650 = vmatpush3.bf16.msra.mxu0 %v3017_v11  ;;  %v3060_v11 = vld [vmem:[%s3237_s16 + $0x70] sm:$0xff]   ;;  %v3085_v61 = vld [vmem:[%s3237_s16 + $0xa0] sm:$0xff]  }
  0x23   : > { %2686 = vmatpush3.bf16.msra.mxu1 %v3018_v12  ;;  %2651 = vmatprep.subr.bf16.mxu0 %v3144_v1  ;;  %v652_v12 = vshrl.u32 %v3059_v58, 16 }
  0x24   : > { %2687 = vmatprep.subr.bf16.mxu1 %v3144_v1 }
  0x26   : > { %2652 = vmatpush3.bf16.msra.mxu0 %v3019_v13  ;;  %v651_v13 = vsel %vm623_vm1, %v646_v8, %v650_v6  ;;  %v3524_v8 = vld [vmem:[%s3237_s16 + $0x8] sm:$0xf] }
  0x27   : > { %2688 = vmatpush3.bf16.msra.mxu1 %v3020_v14  ;;  %2653 = vmatprep.subr.bf16.mxu0 %v3144_v1  ;;  %v3063_v14 = vld [vmem:[%s3741_s1 + $0x118] sm:$0xff]  }
  0x28   : > { %2689 = vmatprep.subr.bf16.mxu1 %v3144_v1 }
  0x2a   : > { %2654 = vmatpush3.bf16.msra.mxu0 %v3021_v15  ;;  %v656_v15 = vshll.u32 %v3065_v9, 16 }
  0x2b   : > { %2690 = vmatpush3.bf16.msra.mxu1 %v3022_v16  ;;  %2711 = vmatprep.subr.bf16.mxu0 %v3144_v1  ;;  %v3067_v16 = vld [vmem:[%s3741_s1 + $0x158] sm:$0xff]  }
  0x2c   : > { %2747 = vmatprep.subr.bf16.mxu1 %v3144_v1 }
  0x2d   : > { %2656 = vmatmul.mubr.bf16.vlgmr.msra.gmra.mxu0 %v3023_v17  ;;  %v654_v17 = vor.u32 %v652_v12, %v650_v6 }
  0x2e   : > { %2692 = vmatmul.mubr.bf16.vlgmr.msra.gmra.mxu1 %v3024_v18  ;;  %2712 = vmatpush3.bf16.msra.mxu0 %v3025_v19  ;;  %v658_v18 = vrot.slane %v656_v15, 1  ;;  %v3068_v19 = vld [vmem:[%s3741_s1 + $0x110] sm:$0xff]   ;;  %v3098_v15 = vld [vmem:[%s3741_s1 + $0x1c8] sm:$0xff]  }
  0x2f   : > { %2713 = vmatprep.subr.bf16.mxu0 %v3144_v1  ;;  %2659 = vmatprep.mubr.msk.bf16.mxu0 %vm3145_vm0, %v3144_v1 }
  0x30   : > { %2695 = vmatprep.mubr.msk.bf16.mxu1 %vm3145_vm0, %v3144_v1  ;;  %2748 = vmatpush3.bf16.msra.mxu1 %v3029_v20  ;;  %v3069_v20 = vld [vmem:[%s3741_s1 + $0x150] sm:$0xff]  }
  0x31   : > { %2749 = vmatprep.subr.bf16.mxu1 %v3144_v1 }
  0x32   : > { %2714 = vmatpush3.bf16.msra.mxu0 %v3026_v21  ;;  %v3066_v21 = vld [vmem:[%s3237_s16 + $0x78] sm:$0xff]  }
  0x33   : > { %2715 = vmatprep.subr.bf16.mxu0 %v3144_v1 }
  0x34   : > { %2750 = vmatpush3.bf16.msra.mxu1 %v3031_v23  ;;  %v659_v23 = vsel %vm623_vm1, %v654_v17, %v658_v18  ;;  %v3546_v17 = vld [vmem:[%s3237_s16 + $0xc] sm:$0xff]  }
  0x35   : > { %2660 = vmatmul.mubr.bf16.gmra.mxu0 %v3027_v22  ;;  %2751 = vmatprep.subr.bf16.mxu1 %v3144_v1  ;;  %v3070_v22 = vld [vmem:[%s3741_s1 + $0x108] sm:$0xff]  }
  0x36   : > { %2696 = vmatmul.mubr.bf16.gmra.mxu1 %v3028_v24  ;;  %2716 = vmatpush3.bf16.msra.mxu0 %v3030_v25  ;;  %v3076_v24 = vld [vmem:[%s3237_s16 + $0x60] sm:$0xff]   ;;  %v3072_v25 = vld [vmem:[%s3741_s1 + $0x148] sm:$0xff]  }
  0x37   : > { %2663 = vmatprep.mubr.msk.bf16.mxu0 %vm3145_vm0, %v3144_v1  ;;  %2699 = vmatprep.mubr.msk.bf16.mxu1 %vm3145_vm0, %v3144_v1 }
  0x38   : > { %2717 = vmatprep.subr.bf16.mxu0 %v3144_v1  ;;  %2752 = vmatpush3.bf16.msra.mxu1 %v3035_v26  ;;  %v660_v26 = vshrl.u32 %v3065_v9, 16  ;;  %v3095_v9 = vld [vmem:[%s3741_s1 + $0x1d0] sm:$0xff]  }
  0x39   : > { %2753 = vmatprep.subr.bf16.mxu1 %v3144_v1 }
  0x3a   : > { %2718 = vmatpush3.bf16.msra.mxu0 %v3034_v27  ;;  %v3073_v27 = vld [vmem:[%s3741_s1 + $0x100] sm:$0xff]  }
  0x3b   : > { %2719 = vmatprep.subr.bf16.mxu0 %v3144_v1 }
  0x3c   : > { %2754 = vmatpush3.bf16.msra.mxu1 %v3037_v29  ;;  %v1220_v29 = vshll.u32 %v3076_v24, 16 }
  0x3d   : > { %2664 = vmatmul.mubr.bf16.gmra.mxu0 %v3032_v28  ;;  %2755 = vmatprep.subr.bf16.mxu1 %v3144_v1  ;;  %v3077_v28 = vld [vmem:[%s3237_s16 + $0x68] sm:$0xff]  }
  0x3e   : > { %2700 = vmatmul.mubr.bf16.gmra.mxu1 %v3033_v30  ;;  %2720 = vmatpush3.bf16.msra.mxu0 %v3036_v31  ;;  %v3074_v30 = vld [vmem:[%s3741_s1 + $0x140] sm:$0xff]   ;;  %v662_v31 = vor.u32 %v660_v26, %v658_v18 }
  0x3f   : > { %2667 = vmatprep.mubr.msk.bf16.mxu0 %vm3145_vm0, %v3144_v1  ;;  %2703 = vmatprep.mubr.msk.bf16.mxu1 %vm3145_vm0, %v3144_v1 }
  0x40   : > { %2721 = vmatprep.subr.bf16.mxu0 %v3144_v1  ;;  %2756 = vmatpush3.bf16.msra.mxu1 %v3040_v32  ;;  %v3071_v32 = vld [vmem:[%s3237_s16 + $0x80] ss:$0 sps:$4 sm:$0xff]  }
  0x41   : > { %2757 = vmatprep.subr.bf16.mxu1 %v3144_v1 }
  0x42   : > { %2722 = vmatpush3.bf16.msra.mxu0 %v3041_v33  ;;  %v1218_v33 = vshrl.u32 %v3076_v24, 16 }
  0x43   : > { %2723 = vmatprep.subr.bf16.mxu0 %v3144_v1 }
  0x44   : > { %2758 = vmatpush3.bf16.msra.mxu1 %v3042_v35  ;;  %v1225_v35 = vshll.u32 %v3077_v28, 16 }
  0x45   : > { %2668 = vmatmul.mubr.bf16.gmra.mxu0 %v3038_v34  ;;  %2759 = vmatprep.subr.bf16.mxu1 %v3144_v1  ;;  %v1222_v34 = vrot.slane %v1220_v29, 1 }
  0x46   : > { %2704 = vmatmul.mubr.bf16.gmra.mxu1 %v3039_v36  ;;  %2671 = vmatprep.mubr.msk.bf16.mxu0 %vm3145_vm0, %v3144_v1  ;;  %v1227_v37 = vrot.slane %v1225_v35, 1 }
  0x47   : > { %2707 = vmatprep.mubr.msk.bf16.mxu1 %vm3145_vm0, %v3144_v1  ;;  %2724 = vmatpush3.bf16.msra.mxu0 %v3043_v38  ;;  %v1223_v36 = vor.u32 %v1222_v34, %v1218_v33  ;;  %v3081_v38 = vld [vmem:[%s3237_s16 + $0x70] sm:$0xff]  }
  0x48   : > { %2760 = vmatpush3.bf16.msra.mxu1 %v3046_v39  ;;  %2725 = vmatprep.subr.bf16.mxu0 %v3144_v1  ;;  %v3075_v39 = vld [vmem:[%s3237_s16 + $0x90] sm:$0xff]  }
  0x49   : > { %2761 = vmatprep.subr.bf16.mxu1 %v3144_v1  ;;  %v1228_v41 = vsel %vm623_vm1, %v1223_v36, %v1227_v37  ;;  %v3566_v33 = vld [vmem:[%s3237_s16 + $0x14] sm:$0xff]   ;;  %v3108_v36 = vld [vmem:[%s3237_s16 + $0x44] sm:$0xff]  }
  0x4b   : > { %2726 = vmatpush3.bf16.msra.mxu0 %v3047_v43  ;;  %v1233_v43 = vshll.u32 %v3081_v38, 16 }
  0x4c   : > { %2762 = vmatpush3.bf16.msra.mxu1 %v3048_v45  ;;  %2783 = vmatprep.subr.bf16.mxu0 %v3144_v1  ;;  %v3079_v45 = vld [vmem:[%s3741_s1 + $0x1b0] sm:$0xff]  }
  0x4d   : > { %2672 = vmatmul.mubr.bf16.gmra.mxu0 %v3044_v42  ;;  %2819 = vmatprep.subr.bf16.mxu1 %v3144_v1  ;;  %v1229_v42 = vshrl.u32 %v3077_v28, 16  ;;  %v1235_v47 = vrot.slane %v1233_v43, 1  ;;  %v1683_v43 = vshll.u32 %v3108_v36, 16 }
  0x4e   : > { %2708 = vmatmul.mubr.bf16.gmra.mxu1 %v3045_v44  ;;  %2727 = vmatprep.mubr.msk.bf16.mxu0 %vm3145_vm0, %v3144_v1  ;;  %v3082_v44 = vld [vmem:[%s3741_s1 + $0x1f8] sm:$0xff]  }
  0x4f   : > { %2763 = vmatprep.mubr.msk.bf16.mxu1 %vm3145_vm0, %v3144_v1  ;;  %v1231_v46 = vor.u32 %v1229_v42, %v1227_v37 }
  0x55   : > { %2728 = vmatmul.mubr.bf16.vlgmr.msra.gmra.mxu0 %v635_v54  ;;  %v1241_v54 = vshll.u32 %v3086_v48, 16 }
  0x56   : > { %2764 = vmatmul.mubr.bf16.vlgmr.msra.gmra.mxu1 %v3051_v52  ;;  %2784 = vmatpush3.bf16.msra.mxu0 %v3052_v53  ;;  %v1236_v52 = vsel %vm623_vm1, %v1231_v46, %v1235_v47  ;;  %v1237_v53 = vshrl.u32 %v3081_v38, 16  ;;  %v3105_v38 = vld [vmem:[%s3741_s1 + $0x238] sm:$0xff]  }
  0x57   : > { %2785 = vmatprep.subr.bf16.mxu0 %v3144_v1  ;;  %2731 = vmatprep.mubr.msk.bf16.mxu0 %vm3145_vm0, %v3144_v1  ;;  %v1243_v58 = vrot.slane %v1241_v54, 1 }
  0x58   : > { %2767 = vmatprep.mubr.msk.bf16.mxu1 %vm3145_vm0, %v3144_v1  ;;  %2820 = vmatpush3.bf16.msra.mxu1 %v3056_v57  ;;  %v1239_v57 = vor.u32 %v1237_v53, %v1235_v47  ;;  %v3582_v47 = vld [vmem:[%s3237_s16 + $0x1c] sm:$0xff]   ;;  %v1462_v53 = vshrl.u32 %v3566_v33, 16 }
  0x59   : > { %2821 = vmatprep.subr.bf16.mxu1 %v3144_v1  ;;  %v1466_v54 = vshll.u32 %v3582_v47, 16 }
  0x5a   : > { %2786 = vmatpush3.bf16.msra.mxu0 %v3053_v59  ;;  %v3092_v59 = vld [vmem:[%s3237_s16 + $0x80] sm:$0x1f]  }
  0x5b   : > { %2787 = vmatprep.subr.bf16.mxu0 %v3144_v1 }
  0x5c   : > { %2822 = vmatpush3.bf16.msra.mxu1 %v3058_v62  ;;  %v3089_v62 = vld [vmem:[%s3741_s1 + $0x198] sm:$0xff]  }
  0x5d   : > { %2732 = vmatmul.mubr.bf16.gmra.mxu0 %v643_v2  ;;  %2823 = vmatprep.subr.bf16.mxu1 %v3144_v1  ;;  %v1249_v2 = vshll.u32 %v3092_v59, 16 }
  0x5e   : > { %2768 = vmatmul.mubr.bf16.gmra.mxu1 %v3055_v63  ;;  %2788 = vmatpush3.bf16.msra.mxu0 %v3057_v3  ;;  %v1244_v63 = vsel %vm623_vm1, %v1239_v57, %v1243_v58  ;;  %v3093_v3 = vld [vmem:[%s3741_s1 + $0x1d8] sm:$0xff]  }
  0x5f   : > { %2735 = vmatprep.mubr.msk.bf16.mxu0 %vm3145_vm0, %v3144_v1  ;;  %2771 = vmatprep.mubr.msk.bf16.mxu1 %vm3145_vm0, %v3144_v1  ;;  %v1251_v6 = vrot.slane %v1249_v2, 1 }
  0x60   : > { %2789 = vmatprep.subr.bf16.mxu0 %v3144_v1  ;;  %2824 = vmatpush3.bf16.msra.mxu1 %v3062_v5  ;;  %v1247_v5 = vor.u32 %v1245_v0, %v1243_v58  ;;  %v3115_v0 = vld [vmem:[%s3237_s16 + $0x54] sm:$0x1f]  }
  0x61   : > { %2825 = vmatprep.subr.bf16.mxu1 %v3144_v1 }
  0x62   : > { %2790 = vmatpush3.bf16.msra.mxu0 %v3061_v7  ;;  %v1390_v7 = vld [vmem:[%s3237_s16 + $0x4] sm:$0xf]  ;;  %v1252_v12 = vsel %vm623_vm1, %v1247_v5, %v1251_v6 }
  0x63   : > { %2791 = vmatprep.subr.bf16.mxu0 %v3144_v1 }
  0x64   : > { %2826 = vmatpush3.bf16.msra.mxu1 %v3064_v10  ;;  %v3091_v10 = vld [vmem:[%s3237_s16 + $0xa8] sm:$0xff]  }
  0x65   : > { %2736 = vmatmul.mubr.bf16.gmra.mxu0 %v651_v13  ;;  %2827 = vmatprep.subr.bf16.mxu1 %v3144_v1  ;;  %v3096_v13 = vld [vmem:[%s3741_s1 + $0x188] sm:$0xff]  }
  0x66   : > { %2772 = vmatmul.mubr.bf16.gmra.mxu1 %v3060_v11  ;;  %2792 = vmatpush3.bf16.msra.mxu0 %v3063_v14  ;;  %v2401_v11 = vcombine.low %v1390_v7, %v3524_v8  ;;  %v3103_v14 = vld [vmem:[%s3237_s16 + $0x34] sm:$0xff]  }
  0x67   : > { %2739 = vmatprep.mubr.msk.bf16.mxu0 %vm3145_vm0, %v3144_v1  ;;  %2775 = vmatprep.mubr.msk.bf16.mxu1 %vm3145_vm0, %v3144_v1  ;;  %v1668_v28 = vshrl.u32 %v3103_v14, 16 }
  0x68   : > { %2793 = vmatprep.subr.bf16.mxu0 %v3144_v1  ;;  %2828 = vmatpush3.bf16.msra.mxu1 %v3067_v16  ;;  %v1253_v16 = vshrl.u32 %v3092_v59, 16  ;;  %v1445_v18 = vshll.u32 %v2401_v11, 16  ;;  %v1468_v59 = vrot.slane %v1466_v54, 1 }
  0x69   : > { %2829 = vmatprep.subr.bf16.mxu1 %v3144_v1 }
  0x6a   : > { %2794 = vmatpush3.bf16.msra.mxu0 %v3068_v19  ;;  %v3099_v19 = vld [vmem:[%s3741_s1 + $0x180] sm:$0xff]   ;;  %v1255_v24 = vor.u32 %v1253_v16, %v1251_v6  ;;  %v1447_v26 = vrot.slane %v1445_v18, 1  ;;  %v3117_v18 = vld [vmem:[%s3741_s1 + $0x208] sm:$0xff]  }
  0x6b   : > { %2795 = vmatprep.subr.bf16.mxu0 %v3144_v1 }
  0x6c   : > { %2830 = vmatpush3.bf16.msra.mxu1 %v3069_v20  ;;  %v3104_v20 = vld [vmem:[%s3237_s16 + $0x3c] sm:$0xff]  }
  0x6d   : > { %2740 = vmatmul.mubr.bf16.gmra.mxu0 %v659_v23  ;;  %2831 = vmatprep.subr.bf16.mxu1 %v3144_v1  ;;  %v3097_v23 = vld [vmem:[%s3237_s16 + $0xb0] ss:$0 sps:$4 sm:$0xff]   ;;  %v1679_v42 = vshrl.u32 %v3104_v20, 16 }
  0x6e   : > { %2776 = vmatmul.mubr.bf16.gmra.mxu1 %v3066_v21  ;;  %2743 = vmatprep.mubr.msk.bf16.mxu0 %vm3145_vm0, %v3144_v1  ;;  %v1670_v21 = vshll.u32 %v3103_v14, 16 }
  0x6f   : > { %2779 = vmatprep.mubr.msk.bf16.mxu1 %vm3145_vm0, %v3144_v1  ;;  %2796 = vmatpush3.bf16.msra.mxu0 %v3070_v22  ;;  %v3100_v22 = vld [vmem:[%s3741_s1 + $0x1c0] sm:$0xff]  }
  0x70   : > { %2832 = vmatpush3.bf16.msra.mxu1 %v3072_v25  ;;  %2797 = vmatprep.subr.bf16.mxu0 %v3144_v1  ;;  %v1443_v25 = vshrl.u32 %v2401_v11, 16  ;;  %v1672_v29 = vrot.slane %v1670_v21, 1  ;;  %v3118_v21 = vld [vmem:[%s3741_s1 + $0x200] sm:$0xff]  }
  0x71   : > { %2833 = vmatprep.subr.bf16.mxu1 %v3144_v1 }
  0x72   : > { %v1673_v34 = vor.u32 %v1672_v29, %v1668_v28  ;;  %v1867_v28 = vrot.slane %v3582_v47, 1 }
  0x73   : > { %2798 = vmatpush3.bf16.msra.mxu0 %v3073_v27  ;;  %v1450_v27 = vshll.u32 %v3546_v17, 16 }
  0x74   : > { %2834 = vmatpush3.bf16.msra.mxu1 %v3074_v30  ;;  %2855 = vmatprep.subr.bf16.mxu0 %v3144_v1  ;;  %v1675_v30 = vshll.u32 %v3104_v20, 16  ;;  %v1703_v20 = vshrl.u32 %v3115_v0, 16 }
  0x75   : > { %2744 = vmatmul.mubr.bf16.gmra.mxu0 %v662_v31  ;;  %2891 = vmatprep.subr.bf16.mxu1 %v3144_v1  ;;  %v1448_v31 = vor.u32 %v1447_v26, %v1443_v25 }
  0x76   : > { %2780 = vmatmul.mubr.bf16.gmra.mxu1 %v3071_v32  ;;  %2799 = vmatprep.mubr.msk.bf16.mxu0 %vm3145_vm0, %v3144_v1  ;;  %v1452_v32 = vrot.slane %v1450_v27, 1  ;;  %v1677_v35 = vrot.slane %v1675_v30, 1  ;;  %v1863_v27 = vrot.slane %v3546_v17, 1 }
  0x77   : > { %2835 = vmatprep.mubr.msk.bf16.mxu1 %vm3145_vm0, %v3144_v1 }
  0x78   : > { %v1453_v37 = vsel %vm623_vm1, %v1448_v31, %v1452_v32  ;;  %v1681_v48 = vor.u32 %v1679_v42, %v1677_v35  ;;  %v1865_v31 = vrot.slane %v3566_v33, 1 }
  0x7d   : > { %2800 = vmatmul.mubr.bf16.vlgmr.msra.gmra.mxu0 %v3075_v39  ;;  %v1454_v39 = vshrl.u32 %v3546_v17, 16  ;;  %v1866_v17 = vsel %vm1861_vm2, %v1863_v27, %v1865_v31 }
  0x7e   : > { %2836 = vmatmul.mubr.bf16.vlgmr.msra.gmra.mxu1 %v1228_v41  ;;  %2856 = vmatpush3.bf16.msra.mxu0 %v3078_v40  ;;  %v1458_v40 = vshll.u32 %v3566_v33, 16  ;;  %v1678_v41 = vsel %vm623_vm1, %v1673_v34, %v1677_v35 }
  0x7f   : > { %2857 = vmatprep.subr.bf16.mxu0 %v3144_v1  ;;  %2803 = vmatprep.mubr.msk.bf16.mxu0 %vm3145_vm0, %v3144_v1 }
  0x80   : > { %2839 = vmatprep.mubr.msk.bf16.mxu1 %vm3145_vm0, %v3144_v1  ;;  %2892 = vmatpush3.bf16.msra.mxu1 %v3082_v44  ;;  %v3106_v44 = vld [vmem:[%s3741_s1 + $0x230] sm:$0xff]   ;;  %v1460_v46 = vrot.slane %v1458_v40, 1 }
  0x81   : > { %2893 = vmatprep.subr.bf16.mxu1 %v3144_v1 }
  0x82   : > { %2858 = vmatpush3.bf16.msra.mxu0 %v3079_v45  ;;  %v1456_v45 = vor.u32 %v1454_v39, %v1452_v32  ;;  %v1464_v58 = vor.u32 %v1462_v53, %v1460_v46  ;;  %v1868_v32 = vsel %vm1861_vm2, %v1865_v31, %v1867_v28 }
  0x83   : > { %2859 = vmatprep.subr.bf16.mxu0 %v3144_v1 }
  0x84   : > { %2894 = vmatpush3.bf16.msra.mxu1 %v3084_v49  ;;  %v1685_v49 = vrot.slane %v1683_v43, 1  ;;  %v1469_v2 = vsel %vm623_vm1, %v1464_v58, %v1468_v59 }
  0x85   : > { %2804 = vmatmul.mubr.bf16.gmra.mxu0 %v3080_v50  ;;  %2895 = vmatprep.subr.bf16.mxu1 %v3144_v1  ;;  %v3111_v50 = vld [vmem:[%s3237_s16 + $0x4c] sm:$0xff]  }
  0x86   : > { %2840 = vmatmul.mubr.bf16.gmra.mxu1 %v1236_v52  ;;  %2860 = vmatpush3.bf16.msra.mxu0 %v3083_v51  ;;  %v1461_v51 = vsel %vm623_vm1, %v1456_v45, %v1460_v46  ;;  %v3109_v52 = vld [vmem:[%s3741_s1 + $0x228] sm:$0xff]   ;;  %v1691_v57 = vshll.u32 %v3111_v50, 16  ;;  %v1695_v7 = vshrl.u32 %v3111_v50, 16 }
  0x87   : > { %2807 = vmatprep.mubr.msk.bf16.mxu0 %vm3145_vm0, %v3144_v1  ;;  %2843 = vmatprep.mubr.msk.bf16.mxu1 %vm3145_vm0, %v3144_v1 }
  0x88   : > { %2861 = vmatprep.subr.bf16.mxu0 %v3144_v1  ;;  %2896 = vmatpush3.bf16.msra.mxu1 %v3088_v55  ;;  %v1686_v55 = vsel %vm623_vm1, %v1681_v48, %v1685_v49 }
  0x89   : > { %2897 = vmatprep.subr.bf16.mxu1 %v3144_v1 }
  0x8a   : > { %2862 = vmatpush3.bf16.msra.mxu0 %v3087_v56  ;;  %v1687_v56 = vshrl.u32 %v3108_v36, 16 }
  0x8b   : > { %2863 = vmatprep.subr.bf16.mxu0 %v3144_v1 }
  0x8c   : > { %2898 = vmatpush3.bf16.msra.mxu1 %v3090_v60  ;;  %v3112_v60 = vld [vmem:[%s3741_s1 + $0x220] sm:$0xff]  }
  0x8d   : > { %2808 = vmatmul.mubr.bf16.gmra.mxu0 %v3085_v61  ;;  %2899 = vmatprep.subr.bf16.mxu1 %v3144_v1  ;;  %v3604_v61 = vld [vmem:[%s3237_s16 + $0x24] sm:$0x1f]  }
  0x8e   : > { %2844 = vmatmul.mubr.bf16.gmra.mxu1 %v1244_v63  ;;  %2864 = vmatpush3.bf16.msra.mxu0 %v3089_v62  ;;  %v1689_v62 = vor.u32 %v1687_v56, %v1685_v49  ;;  %v1693_v63 = vrot.slane %v1691_v57, 1  ;;  %v1474_v5 = vshll.u32 %v3604_v61, 16  ;;  %v1869_v29 = vrot.slane %v3604_v61, 1 }
  0x8f   : > { %2811 = vmatprep.mubr.msk.bf16.mxu0 %vm3145_vm0, %v3144_v1  ;;  %2847 = vmatprep.mubr.msk.bf16.mxu1 %vm3145_vm0, %v3144_v1 }
  0x90   : > { %2865 = vmatprep.subr.bf16.mxu0 %v3144_v1  ;;  %2900 = vmatpush3.bf16.msra.mxu1 %v3093_v3  ;;  %v3113_v3 = vld [vmem:[%s3741_s1 + $0x218] sm:$0xff]   ;;  %v1694_v6 = vsel %vm623_vm1, %v1689_v62, %v1693_v63  ;;  %v1476_v11 = vrot.slane %v1474_v5, 1 }
  0x91   : > { %2901 = vmatprep.subr.bf16.mxu1 %v3144_v1 }
  0x92   : > { %2866 = vmatpush3.bf16.msra.mxu0 %v3094_v4  ;;  %v1470_v4 = vshrl.u32 %v3582_v47, 16 }
  0x93   : > { %2867 = vmatprep.subr.bf16.mxu0 %v3144_v1 }
  0x94   : > { %2902 = vmatpush3.bf16.msra.mxu1 %v3095_v9  ;;  %v1699_v9 = vshll.u32 %v3115_v0, 16 }
  0x95   : > { %2812 = vmatmul.mubr.bf16.gmra.mxu0 %v3091_v10  ;;  %2903 = vmatprep.subr.bf16.mxu1 %v3144_v1  ;;  %v1472_v10 = vor.u32 %v1470_v4, %v1468_v59 }
  0x96   : > { %2848 = vmatmul.mubr.bf16.gmra.mxu1 %v1252_v12  ;;  %2815 = vmatprep.mubr.msk.bf16.mxu0 %vm3145_vm0, %v3144_v1  ;;  %v3116_v12 = vld [vmem:[%s3741_s1 + $0x210] sm:$0xff]   ;;  %v1701_v14 = vrot.slane %v1699_v9, 1 }
  0x97   : > { %2851 = vmatprep.mubr.msk.bf16.mxu1 %vm3145_vm0, %v3144_v1  ;;  %2868 = vmatpush3.bf16.msra.mxu0 %v3096_v13  ;;  %v1697_v13 = vor.u32 %v1695_v7, %v1693_v63 }
  0x98   : > { %2904 = vmatpush3.bf16.msra.mxu1 %v3098_v15  ;;  %2869 = vmatprep.subr.bf16.mxu0 %v3144_v1  ;;  %v1477_v15 = vsel %vm623_vm1, %v1472_v10, %v1476_v11 }
  0x99   : > { %2905 = vmatprep.subr.bf16.mxu1 %v3144_v1  ;;  %v1702_v16 = vsel %vm623_vm1, %v1697_v13, %v1701_v14 }
  0x9b   : > { %2870 = vmatpush3.bf16.msra.mxu0 %v3099_v19  ;;  %v1478_v19 = vshrl.u32 %v3604_v61, 16 }
  0x9c   : > { %2906 = vmatpush3.bf16.msra.mxu1 %v3100_v22  ;;  %2927 = vmatprep.subr.bf16.mxu0 %v3144_v1  ;;  %v1840_v22 = vld [vmem:[%s3237_s16 + $0x4] sm:$0xe] }
  0x9d   : > { %2816 = vmatmul.mubr.bf16.gmra.mxu0 %v3097_v23  ;;  %2963 = vmatprep.subr.bf16.mxu1 %v3144_v1  ;;  %v1480_v23 = vor.u32 %v1478_v19, %v1476_v11  ;;  %v2469_v25 = vcombine.low %v1840_v22, %v3524_v8  ;;  %v1870_v8 = vsel %vm1861_vm2, %v1867_v28, %v1869_v29 }
  0x9e   : > { %2852 = vmatmul.mubr.bf16.gmra.mxu1 %v1255_v24  ;;  %2871 = vmatprep.mubr.msk.bf16.mxu0 %vm3145_vm0, %v3144_v1  ;;  %v1705_v24 = vor.u32 %v1703_v20, %v1701_v14 }
  0x9f   : > { %2907 = vmatprep.mubr.msk.bf16.mxu1 %vm3145_vm0, %v3144_v1  ;;  %v1862_v26 = vrot.slane %v2469_v25, 1 }
  0xa1   : > { %v1864_v30 = vsel %vm1861_vm2, %v1862_v26, %v1863_v27 }
  0xa5   : > { %2872 = vmatmul.mubr.bf16.vlgmr.msra.gmra.mxu0 %v1453_v37 }
  0xa6   : > { %2908 = vmatmul.mubr.bf16.vlgmr.msra.gmra.mxu1 %v1678_v41  ;;  %2928 = vmatpush3.bf16.msra.mxu0 %v3105_v38 }
  0xa7   : > { %2929 = vmatprep.subr.bf16.mxu0 %v3144_v1  ;;  %2875 = vmatprep.mubr.msk.bf16.mxu0 %vm3145_vm0, %v3144_v1 }
  0xa8   : > { %2911 = vmatprep.mubr.msk.bf16.mxu1 %vm3145_vm0, %v3144_v1  ;;  %2971 = vmatpush3.bf16.msra.mxu1 %v3105_v38 }
  0xa9   : > { %2964 = vmatprep.subr.bf16.mxu1 %v3144_v1 }
  0xaa   : > { %2930 = vmatpush3.bf16.msra.mxu0 %v3106_v44 }
  0xab   : > { %2931 = vmatprep.subr.bf16.mxu0 %v3144_v1 }
  0xac   : > { %2972 = vmatpush3.bf16.msra.mxu1 %v3106_v44 }
  0xad   : > { %2876 = vmatmul.mubr.bf16.gmra.mxu0 %v1461_v51  ;;  %2965 = vmatprep.subr.bf16.mxu1 %v3144_v1 }
  0xae   : > { %2912 = vmatmul.mubr.bf16.gmra.mxu1 %v1686_v55  ;;  %2932 = vmatpush3.bf16.msra.mxu0 %v3109_v52 }
  0xaf   : > { %2879 = vmatprep.mubr.msk.bf16.mxu0 %vm3145_vm0, %v3144_v1  ;;  %2915 = vmatprep.mubr.msk.bf16.mxu1 %vm3145_vm0, %v3144_v1 }
  0xb0   : > { %2933 = vmatprep.subr.bf16.mxu0 %v3144_v1  ;;  %2973 = vmatpush3.bf16.msra.mxu1 %v3109_v52 }
  0xb1   : > { %2966 = vmatprep.subr.bf16.mxu1 %v3144_v1 }
  0xb2   : > { %2934 = vmatpush3.bf16.msra.mxu0 %v3112_v60 }
  0xb3   : > { %2935 = vmatprep.subr.bf16.mxu0 %v3144_v1 }
  0xb4   : > { %2974 = vmatpush3.bf16.msra.mxu1 %v3112_v60 }
  0xb5   : > { %2880 = vmatmul.mubr.bf16.gmra.mxu0 %v1469_v2  ;;  %2967 = vmatprep.subr.bf16.mxu1 %v3144_v1 }
  0xb6   : > { %2916 = vmatmul.mubr.bf16.gmra.mxu1 %v1694_v6  ;;  %2936 = vmatpush3.bf16.msra.mxu0 %v3113_v3 }
  0xb7   : > { %2883 = vmatprep.mubr.msk.bf16.mxu0 %vm3145_vm0, %v3144_v1  ;;  %2919 = vmatprep.mubr.msk.bf16.mxu1 %vm3145_vm0, %v3144_v1 }
  0xb8   : > { %2975 = vmatpush3.bf16.msra.mxu1 %v3113_v3  ;;  %2937 = vmatprep.subr.bf16.mxu0 %v3144_v1 }
  0xb9   : > { %2968 = vmatprep.subr.bf16.mxu1 %v3144_v1 }
  0xba   : > { %2938 = vmatpush3.bf16.msra.mxu0 %v3116_v12 }
  0xbb   : > { %2939 = vmatprep.subr.bf16.mxu0 %v3144_v1 }
  0xbc   : > { %2976 = vmatpush3.bf16.msra.mxu1 %v3116_v12 }
  0xbd   : > { %2884 = vmatmul.mubr.bf16.gmra.mxu0 %v1477_v15  ;;  %2969 = vmatprep.subr.bf16.mxu1 %v3144_v1 }
  0xbe   : > { %2920 = vmatmul.mubr.bf16.gmra.mxu1 %v1702_v16  ;;  %2887 = vmatprep.mubr.msk.bf16.mxu0 %vm3145_vm0, %v3144_v1 }
  0xbf   : > { %2923 = vmatprep.mubr.msk.bf16.mxu1 %vm3145_vm0, %v3144_v1  ;;  %2940 = vmatpush3.bf16.msra.mxu0 %v3117_v18 }
  0xc0   : > { %2977 = vmatpush3.bf16.msra.mxu1 %v3117_v18  ;;  %2941 = vmatprep.subr.bf16.mxu0 %v3144_v1 }
  0xc1   : > { %2970 = vmatprep.subr.bf16.mxu1 %v3144_v1 }
  0xc3   : > { %2942 = vmatpush3.bf16.msra.mxu0 %v3118_v21 }
  0xc4   : > { %2978 = vmatpush3.bf16.msra.mxu1 %v3118_v21 }
  0xc5   : > { %2888 = vmatmul.mubr.bf16.gmra.mxu0 %v1480_v23 }
  0xc6   : > { %2924 = vmatmul.mubr.bf16.gmra.mxu1 %v1705_v24  ;;  %2943 = vmatprep.mubr.msk.bf16.mxu0 %vm3145_vm0, %v3144_v1 }
  0xc7   : > { %2955 = vmatprep.mubr.msk.bf16.mxu1 %vm3145_vm0, %v3144_v1 }
  0xcd   : > { %2944 = vmatmul.mubr.bf16.vlgmr.msra.gmra.mxu0 %v1864_v30 }
  0xce   : > { %2956 = vmatmul.mubr.bf16.vlgmr.msra.gmra.mxu1 %v1870_v8  ;;  %2947 = vmatprep.mubr.msk.bf16.mxu0 %vm3145_vm0, %v3144_v1 }
  0xcf   : > { %2959 = vmatprep.mubr.msk.bf16.mxu1 %vm3145_vm0, %v3144_v1 }
  0xd5   : > { %2948 = vmatmul.mubr.bf16.gmra.mxu0 %v1866_v17 }
  0xd6   : > { %2960 = vmatmul.mubr.bf16.gmra.mxu1 %v1869_v29  ;;  %2951 = vmatprep.mubr.msk.bf16.mxu0 %vm3145_vm0, %v3144_v1 }
  0xdd   : > { %2952 = vmatmul.mubr.bf16.gmra.mxu0 %v1868_v32 }
  0xed   : > { %v385_v34 = vpop.f32.mrf.mxu0 }
  0xee   : > { %v533_v35 = vpop.f32.mrf.mxu1 }
  0xef   : > { %v534_v36 = vadd.f32 %v533_v35, %v385_v34  ;;  %v2657_v37 = vpop.f32.mrf.mxu0 }
  0xf0   : > { %v2693_v38 = vpop.f32.mrf.mxu1 }
  0xf1   : > { %v388_v39 = vpop.f32.mrf.mxu0 }
  0xf2   : > { %v536_v40 = vpop.f32.mrf.mxu1 }
  0xf3   : > { %v537_v41 = vadd.f32 %v536_v40, %v388_v39  ;;  %v2658_v33 = vpop.f32.mrf.mxu0 }
  0xf4   : > { %v2694_v42 = vpop.f32.mrf.mxu1 }
  0xf5   : > { %v393_v43 = vpop.f32.mrf.mxu0 }
  0xf6   : > { %v541_v44 = vpop.f32.mrf.mxu1 }
  0xf7   : > { %v542_v45 = vadd.f32 %v541_v44, %v393_v43  ;;  %v2661_v46 = vpop.f32.mrf.mxu0 }
  0xf8   : > { %v2697_v47 = vpop.f32.mrf.mxu1 }
  0xf9   : > { %v396_v48 = vpop.f32.mrf.mxu0 }
  0xfa   : > { %v544_v49 = vpop.f32.mrf.mxu1 }
  0xfb   : > { %v545_v1 = vadd.f32 %v544_v49, %v396_v48  ;;  %v2662_v50 = vpop.f32.mrf.mxu0 }
  0xfc   : > { %v2698_v51 = vpop.f32.mrf.mxu1 }
  0xfd   : > { %v401_v52 = vpop.f32.mrf.mxu0 }
  0xfe   : > { %v549_v53 = vpop.f32.mrf.mxu1 }
  0xff   : > { %v550_v54 = vadd.f32 %v549_v53, %v401_v52  ;;  %v2665_v55 = vpop.f32.mrf.mxu0 }
 0x100   : > { %v2701_v56 = vpop.f32.mrf.mxu1 }
 0x101   : > { %v404_v57 = vpop.f32.mrf.mxu0 }
 0x102   : > { %v552_v58 = vpop.f32.mrf.mxu1 }
 0x103   : > { %v553_v59 = vadd.f32 %v552_v58, %v404_v57  ;;  %v2666_v60 = vpop.f32.mrf.mxu0 }
 0x104   : > { %v2702_v61 = vpop.f32.mrf.mxu1 }
 0x105   : > { %v409_v62 = vpop.f32.mrf.mxu0 }
 0x106   : > { %v557_v63 = vpop.f32.mrf.mxu1 }
 0x107   : > { %v558_v0 = vadd.f32 %v557_v63, %v409_v62  ;;  %v2669_v2 = vpop.f32.mrf.mxu0 }
 0x108   : > { %v2705_v3 = vpop.f32.mrf.mxu1 }
 0x109   : > { %v412_v4 = vpop.f32.mrf.mxu0 }
 0x10a   : > { %v560_v5 = vpop.f32.mrf.mxu1 }
 0x10b   : > { %v561_v6 = vadd.f32 %v560_v5, %v412_v4  ;;  %v2670_v7 = vpop.f32.mrf.mxu0 }
 0x10c   : > { %v2706_v9 = vpop.f32.mrf.mxu1 }
 0x10d   : > { %v417_v10 = vpop.f32.mrf.mxu0 }
 0x10e   : > { %v565_v11 = vpop.f32.mrf.mxu1 }
 0x10f   : > { %v566_v12 = vadd.f32 %v565_v11, %v417_v10  ;;  %v2673_v13 = vpop.f32.mrf.mxu0 }
 0x110   : > { %v2709_v14 = vpop.f32.mrf.mxu1 }
 0x111   : > { %v420_v15 = vpop.f32.mrf.mxu0 }
 0x112   : > { %v568_v16 = vpop.f32.mrf.mxu1 }
 0x113   : > { %v2674_v18 = vpop.f32.mrf.mxu0 }
 0x114   : > { %v2710_v19 = vpop.f32.mrf.mxu1 }
 0x115   : > { %v750_v20 = vpop.f32.mrf.mxu0 }
 0x116   : > { %v788_v21 = vadd.f32 %v750_v20, %v534_v36  ;;  %v934_v22 = vpop.f32.mrf.mxu1 }
 0x117   : > { %v2729_v23 = vpop.f32.mrf.mxu0 }
 0x118   : > { %v972_v24 = vadd.f32 %v934_v22, %v788_v21  ;;  %v2765_v25 = vpop.f32.mrf.mxu1 }
 0x119   : > { %v753_v26 = vpop.f32.mrf.mxu0 }
 0x11a   : > { %v789_v27 = vadd.f32 %v753_v26, %v537_v41  ;;  %v937_v28 = vpop.f32.mrf.mxu1 }
 0x11b   : > { %v2730_v29 = vpop.f32.mrf.mxu0 }
 0x11c   : > { %v973_v30 = vadd.f32 %v937_v28, %v789_v27  ;;  %v2766_v8 = vpop.f32.mrf.mxu1 }
 0x11d   : > { %v758_v31 = vpop.f32.mrf.mxu0 }
 0x11e   : > { %v790_v17 = vadd.f32 %v758_v31, %v542_v45  ;;  %v942_v32 = vpop.f32.mrf.mxu1 }
 0x11f   : > { %v2733_v34 = vpop.f32.mrf.mxu0 }
 0x120   : > { %v974_v35 = vadd.f32 %v942_v32, %v790_v17  ;;  %v2769_v37 = vpop.f32.mrf.mxu1 }
 0x121   : > { %v761_v38 = vpop.f32.mrf.mxu0 }
 0x122   : > { %v791_v39 = vadd.f32 %v761_v38, %v545_v1  ;;  %v945_v40 = vpop.f32.mrf.mxu1 }
 0x123   : > { %v2734_v36 = vpop.f32.mrf.mxu0 }
 0x124   : > { %v975_v33 = vadd.f32 %v945_v40, %v791_v39  ;;  %v2770_v42 = vpop.f32.mrf.mxu1 }
 0x125   : > { %v766_v43 = vpop.f32.mrf.mxu0 }
 0x126   : > { %v792_v44 = vadd.f32 %v766_v43, %v550_v54  ;;  %v950_v46 = vpop.f32.mrf.mxu1 }
 0x127   : > { %v2737_v41 = vpop.f32.mrf.mxu0 }
 0x128   : > { %v976_v47 = vadd.f32 %v950_v46, %v792_v44  ;;  %v2773_v48 = vpop.f32.mrf.mxu1 }
 0x129   : > { %v769_v49 = vpop.f32.mrf.mxu0 }
 0x12a   : > { %v793_v50 = vadd.f32 %v769_v49, %v553_v59  ;;  %v953_v51 = vpop.f32.mrf.mxu1 }
 0x12b   : > { %v2738_v45 = vpop.f32.mrf.mxu0 }
 0x12c   : > { %v977_v52 = vadd.f32 %v953_v51, %v793_v50  ;;  %v2774_v53 = vpop.f32.mrf.mxu1 }
 0x12d   : > { %v774_v55 = vpop.f32.mrf.mxu0 }
 0x12e   : > { %v794_v56 = vadd.f32 %v774_v55, %v558_v0  ;;  %v958_v57 = vpop.f32.mrf.mxu1 }
 0x12f   : > { %v2741_v1 = vpop.f32.mrf.mxu0 }
 0x130   : > { %v3664_v58 = vadd.f32 %v958_v57, %v794_v56  ;;  %v2777_v60 = vpop.f32.mrf.mxu1 }
 0x131   : > { %v777_v61 = vpop.f32.mrf.mxu0 }
 0x132   : > { %v795_v62 = vadd.f32 %v777_v61, %v561_v6  ;;  %v961_v54 = vpop.f32.mrf.mxu1 }
 0x133   : > { %v2742_v63 = vpop.f32.mrf.mxu0 }
 0x134   : > { %v3666_v2 = vadd.f32 %v961_v54, %v795_v62  ;;  %v2778_v3 = vpop.f32.mrf.mxu1 }
 0x135   : > { %v782_v4 = vpop.f32.mrf.mxu0 }
 0x136   : > { %v796_v59 = vadd.f32 %v782_v4, %v566_v12  ;;  %v966_v5 = vpop.f32.mrf.mxu1 }
 0x137   : > { %v2745_v7 = vpop.f32.mrf.mxu0 }
 0x138   : > { %v3668_v9 = vadd.f32 %v966_v5, %v796_v59  ;;  %v2781_v10 = vpop.f32.mrf.mxu1 }
 0x139   : > { %v785_v0 = vpop.f32.mrf.mxu0 }
 0x13a   : > { %v969_v11 = vpop.f32.mrf.mxu1 }
 0x13b   : > { %v2746_v13 = vpop.f32.mrf.mxu0 }
 0x13c   : > { %v2782_v14 = vpop.f32.mrf.mxu1 }
 0x13d   : > { %v1118_v15 = vpop.f32.mrf.mxu0 }
 0x13e   : > { %v1156_v16 = vadd.f32 %v1118_v15, %v972_v24  ;;  %v1343_v18 = vpop.f32.mrf.mxu1 }
 0x13f   : > { %v2801_v6 = vpop.f32.mrf.mxu0 }
 0x140   : > { %v3670_v19 = vadd.f32 %v1343_v18, %v1156_v16  ;;  %v2837_v20 = vpop.f32.mrf.mxu1 }
 0x141   : > { %v1121_v21 = vpop.f32.mrf.mxu0 }
 0x142   : > { %v1157_v22 = vadd.f32 %v1121_v21, %v973_v30  ;;  %v1346_v23 = vpop.f32.mrf.mxu1 }
 0x143   : > { %v2802_v12 = vpop.f32.mrf.mxu0 }
 0x144   : > { %v3672_v25 = vadd.f32 %v1346_v23, %v1157_v22  ;;  %v2838_v26 = vpop.f32.mrf.mxu1 }
 0x145   : > { %v1126_v27 = vpop.f32.mrf.mxu0 }
 0x146   : > { %v1158_v28 = vadd.f32 %v1126_v27, %v974_v35  ;;  %v1351_v29 = vpop.f32.mrf.mxu1 }
 0x147   : > { %v2805_v8 = vpop.f32.mrf.mxu0 }
 0x148   : > { %v3674_v31 = vadd.f32 %v1351_v29, %v1158_v28  ;;  %v2841_v17 = vpop.f32.mrf.mxu1 }
 0x149   : > { %v1129_v24 = vpop.f32.mrf.mxu0 }
 0x14a   : > { %v1159_v32 = vadd.f32 %v1129_v24, %v975_v33  ;;  %v1354_v34 = vpop.f32.mrf.mxu1 }
 0x14b   : > { %v2806_v37 = vpop.f32.mrf.mxu0 }
 0x14c   : > { %v3676_v38 = vadd.f32 %v1354_v34, %v1159_v32  ;;  %v2842_v39 = vpop.f32.mrf.mxu1 }
 0x14d   : > { %v1134_v30 = vpop.f32.mrf.mxu0 }
 0x14e   : > { %v1160_v40 = vadd.f32 %v1134_v30, %v976_v47  ;;  %v1359_v36 = vpop.f32.mrf.mxu1 }
 0x14f   : > { %v2809_v42 = vpop.f32.mrf.mxu0 }
 0x150   : > { %v3678_v43 = vadd.f32 %v1359_v36, %v1160_v40  ;;  %v2845_v44 = vpop.f32.mrf.mxu1 }
 0x151   : > { %v1137_v35 = vpop.f32.mrf.mxu0 }
 0x152   : > { %v1161_v46 = vadd.f32 %v1137_v35, %v977_v52  ;;  %v1362_v41 = vpop.f32.mrf.mxu1 }
 0x153   : > { %v2810_v48 = vpop.f32.mrf.mxu0 }
 0x154   : > { %v3680_v49 = vadd.f32 %v1362_v41, %v1161_v46  ;;  %v2846_v50 = vpop.f32.mrf.mxu1 }
 0x155   : > { %v1142_v33 = vpop.f32.mrf.mxu0 }
 0x156   : > { %v1367_v51 = vpop.f32.mrf.mxu1  ;;  %v1162_v40 = vadd.f32 %v1142_v33, %v3664_v58 }
 0x157   : > { %v2813_v45 = vpop.f32.mrf.mxu0 }
 0x158   : > { %v2849_v53 = vpop.f32.mrf.mxu1  ;;  %v1387_v46 = vadd.f32 %v1367_v51, %v1162_v40 }
 0x159   : > { %v1145_v55 = vpop.f32.mrf.mxu0 }
 0x15a   : > { %v1370_v56 = vpop.f32.mrf.mxu1  ;;  %v1163_v41 = vadd.f32 %v1145_v55, %v3666_v2 }
 0x15b   : > { %v2814_v57 = vpop.f32.mrf.mxu0 }
 0x15c   : > { %v2850_v47 = vpop.f32.mrf.mxu1 }
 0x15d   : > { %v1150_v1 = vpop.f32.mrf.mxu0 }
 0x15e   : > { %v1375_v60 = vpop.f32.mrf.mxu1 }
 0x15f   : > { %v2817_v61 = vpop.f32.mrf.mxu0 }
 0x160   : > { %v2853_v62 = vpop.f32.mrf.mxu1  ;;  %v1388_v61 = vadd.f32 %v1370_v56, %v1163_v41 }
 0x161   : > { %v1153_v54 = vpop.f32.mrf.mxu0  ;;  %v1164_v62 = vadd.f32 %v1150_v1, %v3668_v9 }
 0x162   : > { %v1378_v63 = vpop.f32.mrf.mxu1 }
 0x163   : > { %v2818_v52 = vpop.f32.mrf.mxu0  ;;  %v1389_v55 = vadd.f32 %v1375_v60, %v1164_v62 }
 0x164   : > { %v2854_v3 = vpop.f32.mrf.mxu1 }
 0x165   : > { %v1568_v4 = vpop.f32.mrf.mxu0 }
 0x166   : > { %v1793_v59 = vpop.f32.mrf.mxu1  ;;  %v1606_v50 = vadd.f32 %v1568_v4, %v3670_v19  ;;  %v3700_v19 = vld [vmem:[%s3742_s2] ss:$0 sm:$0xff] }
 0x167   : > { %v2873_v5 = vpop.f32.mrf.mxu0 }
 0x168   : > { %v2909_v7 = vpop.f32.mrf.mxu1  ;;  %v1831_v63 = vadd.f32 %v1793_v59, %v1606_v50 }
 0x169   : > { %v1571_v10 = vpop.f32.mrf.mxu0 }
 0x16a   : > { %v1796_v0 = vpop.f32.mrf.mxu1  ;;  %v1607_v58 = vadd.f32 %v1571_v10, %v3672_v25 }
 0x16b   : > { %v2874_v11 = vpop.f32.mrf.mxu0 }
 0x16c   : > { %v2910_v13 = vpop.f32.mrf.mxu1  ;;  %v1832_v9 = vadd.f32 %v1796_v0, %v1607_v58 }
 0x16d   : > { %v1576_v14 = vpop.f32.mrf.mxu0 }
 0x16e   : > { %v1801_v15 = vpop.f32.mrf.mxu1  ;;  %v1608_v1 = vadd.f32 %v1576_v14, %v3674_v31 }
 0x16f   : > { %v2877_v16 = vpop.f32.mrf.mxu0 }
 0x170   : > { %v2913_v18 = vpop.f32.mrf.mxu1 }
 0x171   : > { %v1579_v6 = vpop.f32.mrf.mxu0 }
 0x172   : > { %v3682_v20 = vpop.f32.mrf.mxu1 }
 0x173   : > { %v2878_v21 = vpop.f32.mrf.mxu0 }
 0x174   : > { %v2914_v22 = vpop.f32.mrf.mxu1 }
 0x175   : > { %v3684_v23 = vpop.f32.mrf.mxu0  ;;  %v1833_v22 = vadd.f32 %v1801_v15, %v1608_v1 }
 0x176   : > { %v3686_v12 = vpop.f32.mrf.mxu1 }
 0x177   : > { %v2881_v26 = vpop.f32.mrf.mxu0 }
 0x178   : > { %v2917_v27 = vpop.f32.mrf.mxu1  ;;  %v1609_v26 = vadd.f32 %v1579_v6, %v3676_v38 }
 0x179   : > { %v3688_v28 = vpop.f32.mrf.mxu0 }
 0x17a   : > { %v3690_v29 = vpop.f32.mrf.mxu1 }
 0x17b   : > { %v2882_v8 = vpop.f32.mrf.mxu0 }
 0x17c   : > { %v2918_v17 = vpop.f32.mrf.mxu1 }
 0x17d   : > { %v1592_v24 = vpop.f32.mrf.mxu0 }
 0x17e   : > { %v1817_v32 = vpop.f32.mrf.mxu1  ;;  %v1612_v53 = vadd.f32 %v1592_v24, %v1387_v46 }
 0x17f   : > { %v2885_v34 = vpop.f32.mrf.mxu0 }
 0x180   : > { %v2921_v37 = vpop.f32.mrf.mxu1  ;;  %v1837_v52 = vadd.f32 %v1817_v32, %v1612_v53 }
 0x181   : > { %v1595_v39 = vpop.f32.mrf.mxu0 }
 0x182   : > { %v1820_v30 = vpop.f32.mrf.mxu1  ;;  %v1613_v3 = vadd.f32 %v1595_v39, %v1388_v61  ;;  %v1834_v39 = vadd.f32 %v3682_v20, %v1609_v26 }
 0x183   : > { %v2886_v36 = vpop.f32.mrf.mxu0 }
 0x184   : > { %v2922_v42 = vpop.f32.mrf.mxu1  ;;  %v1838_v25 = vadd.f32 %v1820_v30, %v1613_v3  ;;  %v1610_v30 = vadd.f32 %v3684_v23, %v3678_v43  ;;  %v1611_v43 = vadd.f32 %v3688_v28, %v3680_v49 }
 0x185   : > { %v1600_v44 = vpop.f32.mrf.mxu0 }
 0x186   : > { %v1825_v35 = vpop.f32.mrf.mxu1  ;;  %v1614_v7 = vadd.f32 %v1600_v44, %v1389_v55  ;;  %v1835_v20 = vadd.f32 %v3686_v12, %v1610_v30  ;;  %v1836_v58 = vadd.f32 %v3690_v29, %v1611_v43 }
 0x187   : > { %v2889_v48 = vpop.f32.mrf.mxu0 }
 0x188   : > { %v2925_v45 = vpop.f32.mrf.mxu1  ;;  %v1839_v31 = vadd.f32 %v1825_v35, %v1614_v7 }
 0x189   : > { %v1603_v57 = vpop.f32.mrf.mxu0 }
 0x18a   : > { %v1828_v47 = vpop.f32.mrf.mxu1 }
 0x18b   : > { %v2890_v54 = vpop.f32.mrf.mxu0 }
 0x18c   : > { %v2926_v33 = vpop.f32.mrf.mxu1 }
 0x18d   : > { %v1958_v51 = vpop.f32.mrf.mxu0 }
 0x18e   : > { %v1996_v5 = vadd.f32 %v1958_v51, %v1831_v63  ;;  %v1982_v2 = vpop.f32.mrf.mxu1 }
 0x18f   : > { %v2002_v56 = vadd.f32 %v1982_v2, %v1837_v52  ;;  %v2945_v4 = vpop.f32.mrf.mxu0 }
 0x190   : > { %v2957_v59 = vpop.f32.mrf.mxu1  ;;  %v2012_v11 = vadd.f32 %v3700_v19, %v1996_v5 }
 0x191   : > { %v1961_v10 = vpop.f32.mrf.mxu0  ;;  %v2018_v60 = vadd.f32 %v3700_v19, %v2002_v56 }
 0x192   : > { %v1997_v13 = vadd.f32 %v1961_v10, %v1832_v9  ;;  %v1985_v16 = vpop.f32.mrf.mxu1  ;;  %v2021_v17 = vmax.f32 %v2012_v11, 0.0 }
 0x193   : > { %v2003_v18 = vadd.f32 %v1985_v16, %v1838_v25  ;;  %v2946_v21 = vpop.f32.mrf.mxu0  ;;  %v2027_v37 = vmax.f32 %v2018_v60, 0.0 }
 0x194   : > { %v2013_v0 = vadd.f32 %v3700_v19, %v1997_v13  ;;  %v2958_v27 = vpop.f32.mrf.mxu1 }
 0x195   : > { %v2019_v14 = vadd.f32 %v3700_v19, %v2003_v18  ;;  %v1966_v8 = vpop.f32.mrf.mxu0 }
 0x196   : > { %v2022_v24 = vmax.f32 %v2013_v0, 0.0  ;;  %v1998_v32 = vadd.f32 %v1966_v8, %v1833_v22  ;;  %v1990_v34 = vpop.f32.mrf.mxu1 }
 0x197   : > { %v2028_v38 = vmax.f32 %v2019_v14, 0.0  ;;  %v2004_v15 = vadd.f32 %v1990_v34, %v1839_v31  ;;  %v2949_v6 = vpop.f32.mrf.mxu0 }
 0x198   : > { %v2502_v40 = vpack.c.bf16 %v2022_v24, %v2021_v17  ;;  %v2961_v36 = vpop.f32.mrf.mxu1  ;;  %v2014_v46 = vadd.f32 %v3700_v19, %v1998_v32 }
 0x199   : > { %v2517_v42 = vpack.c.bf16 %v2028_v38, %v2027_v37  ;;  %v2020_v44 = vadd.f32 %v3700_v19, %v2004_v15  ;;  %v1969_v35 = vpop.f32.mrf.mxu0 }
 0x19a   : > { %2503 = vst [vmem:[%s3712_s12] sm:$0xff] %v2502_v40   ;;  %v1999_v41 = vadd.f32 %v1969_v35, %v1834_v39  ;;  %v1993_v48 = vpop.f32.mrf.mxu1  ;;  %v2023_v61 = vmax.f32 %v2014_v46, 0.0 }
 0x19b   : > { %2521 = vst [vmem:[%s3712_s12 + $0x18] sm:$0xff] %v2517_v42   ;;  %v2029_v50 = vmax.f32 %v2020_v44, 0.0  ;;  %v2950_v45 = vpop.f32.mrf.mxu0 }
 0x19c   : > { %v2015_v23 = vadd.f32 %v3700_v19, %v1999_v41  ;;  %v2962_v53 = vpop.f32.mrf.mxu1 }
 0x19d   : > { %v2498_v57 = vpack.c.bf16 %v2029_v50, %v2029_v50  ;;  %v1974_v47 = vpop.f32.mrf.mxu0 }
 0x19e   : > { %v2024_v62 = vmax.f32 %v2015_v23, 0.0  ;;  %v2000_v54 = vadd.f32 %v1974_v47, %v1835_v20 }
 0x19f   : > { %2075 = vst [vmem:[%s3712_s12 + $0x20] sm:$0xf] %v2498_v57  ;;  %v2953_v63 = vpop.f32.mrf.mxu0 }
 0x1a0   : > { %v2507_v33 = vpack.c.bf16 %v2024_v62, %v2023_v61  ;;  %v2016_v12 = vadd.f32 %v3700_v19, %v2000_v54 }
 0x1a1   : > { %v1977_v52 = vpop.f32.mrf.mxu0 }
 0x1a2   : > { %2519 = vst [vmem:[%s3712_s12 + $0x8] sm:$0xff] %v2507_v33   ;;  %v2001_v3 = vadd.f32 %v1977_v52, %v1836_v58  ;;  %v2025_v51 = vmax.f32 %v2016_v12, 0.0 }
 0x1a3   : > { %v2954_v49 = vpop.f32.mrf.mxu0 }
 0x1a4   : > { %v2017_v28 = vadd.f32 %v3700_v19, %v2001_v3 }
 0x1a6   : > { %v2026_v5 = vmax.f32 %v2017_v28, 0.0 }
 0x1a8   : > { %v2512_v2 = vpack.c.bf16 %v2026_v5, %v2025_v51 }
 0x1aa   : > { %2520 = vst [vmem:[%s3712_s12 + $0x10] sm:$0xff] %v2512_v2  }
 0x1ab PF: > { %s13_s14 = sadd.s32 1, %s3142_s14   ;;  %s3744_s12 = smov %s3138_s13 }
 0x1ac   : > { %p10_p5 = scmp.ge.s32.totalorder %s13_s14, 4   ;;  %s3745_s13 = smov %s3747_s15 }
 0x1ae   :  { %12 = sbr.rel (!%p10_p5) target bundleno = 2 (0x2), region = 79 }

</bundles_post_ra>
